<compile_context>
chip_gen: v6e
topology: v6e:2x2x1
jax: 0.10.0
libtpu: 0.0.40
codegen_flags: <defaults>
</compile_context>

<pallas_src>
import jax
import jax.numpy as jnp
from jax import lax
from jax.experimental import pallas as pl
from jax.experimental.pallas import tpu as pltpu


# ---------------------------------------------------------------------------
# Host-side weight preparation (done ONCE, outside the per-step jit)
# ---------------------------------------------------------------------------
def _banded_conv_weights(w_hwio, wi_count, wo_count, pad):
    """(3,3,Cin,Cout) HWIO kernel -> 3 banded matrices with the lane pad baked in.

    B[kh][wi*Cin+ci, wo*Cout+co] = w[kh, wi-wo+pad, ci, co] if 0 <= wi-wo+pad < 3
    so for an activation stored at LANE OFFSET 0 (no left/right zero columns) of a
    row-padded buffer P (zero rows on top/bottom only):
        out(ho, wo*Cout+co) = sum_kh P[ho+kh, :] @ B[kh]
    Taps that would read the left/right zero padding are simply dropped (they are
    zero contributions), which is why no zero columns are needed in the buffer.
    """
    _, _, cin, cout = w_hwio.shape
    wi = jnp.arange(wi_count)[:, None]           # (wi, 1)
    wo = jnp.arange(wo_count)[None, :]           # (1, wo)
    kw = wi - wo + pad                           # (wi, wo)
    valid = (kw >= 0) & (kw < 3)
    kw_c = jnp.clip(kw, 0, 2)
    b = w_hwio[:, kw_c, :, :]                    # (3, wi, wo, cin, cout)
    b = jnp.where(valid[None, :, :, None, None], b, 0.0)
    b = b.transpose(0, 1, 3, 2, 4)               # (3, wi, cin, wo, cout)
    return b.reshape(3, wi_count * cin, wo_count * cout)


def _fc_weights(fc_w, cout, h1, w1, nact):
    """Permute fc weights (PyTorch NCHW-flatten row order) so they consume the
    kernel's lane-dense (H1, W1*Cout) activation directly:
       Wflat[wo*Cout+co, ho*nact+o] = fc_w[co*H1*W1 + ho*W1 + wo, o]
    """
    wfc = fc_w.reshape(cout, h1, w1, nact)       # [co, ho, wo, o]
    wfc = wfc.transpose(1, 2, 0, 3)              # [ho, wo, co, o]
    wfc = wfc.reshape(h1, w1 * cout, nact)       # [ho, wo*cout+co, o]
    wfc = wfc.transpose(1, 0, 2)                 # [k, ho, o]
    return wfc.reshape(w1 * cout, h1 * nact)     # [k, ho*nact+o]


def prepare_params(params, input_dims):
    """One-time layout/cast work: banded bf16 conv weights, permuted bf16 FC
    weights, FC block-diagonal mask + regroup selection matrix, bias."""
    h, w = int(input_dims[-2]), int(input_dims[-1])
    cu = params["w1"].shape[-1]
    nact = params["fc_w"].shape[-1]
    h1, w1 = h + 2, w + 2

    b1 = _banded_conv_weights(params["w1"], w, w1, 2).astype(jnp.bfloat16)
    b2 = _banded_conv_weights(params["w2"], w1, w1, 1).astype(jnp.bfloat16)
    b3 = _banded_conv_weights(params["w3"], w1, w1, 1).astype(jnp.bfloat16)
    b4 = _banded_conv_weights(params["w4"], w1, w1, 1).astype(jnp.bfloat16)
    wfc = _fc_weights(params["fc_w"], cu, h1, w1, nact).astype(jnp.bfloat16)

    j = jnp.arange(h1 * nact)
    mask = (j[None, :] // nact == jnp.arange(h1)[:, None]).astype(jnp.float32)     # (h1, h1*nact)
    sel = (j[:, None] % nact == jnp.arange(nact)[None, :]).astype(jnp.float32)     # (h1*nact, nact)
    fcb = params["fc_b"].reshape(1, nact).astype(jnp.float32)

    return {"b1": b1, "b2": b2, "b3": b3, "b4": b4,
            "wfc": wfc, "mask": mask, "sel": sel, "fcb": fcb}


# ---------------------------------------------------------------------------
# Fused Pallas kernel: conv1..conv4 (+ReLU) + flatten + fc, one batch element
# ---------------------------------------------------------------------------
def _make_fused_kernel(h, w, cin, cu, h1, w1, nact):
    def kernel(x_ref, b1_ref, b2_ref, b3_ref, b4_ref, wfc_ref, mask_ref,
               sel_ref, fcb_ref, o_ref, p1, p2, p3, p4):
        # Zero only the border rows (never written elsewhere).  No persistence
        # assumptions -> correct regardless of how the grid maps onto cores.
        z1 = jnp.zeros((2, w * cin), jnp.bfloat16)
        p1[0:2, :] = z1
        p1[2 + h:4 + h, :] = z1
        zr = jnp.zeros((1, w1 * cu), jnp.bfloat16)
        for p in (p2, p3, p4):
            p[0:1, :] = zr
            p[1 + h1:2 + h1, :] = zr

        def conv_relu(p_ref, b_ref):
            # 3 MXU pushes per layer against the banded weights (f32 accum).
            acc = jnp.zeros((h1, w1 * cu), dtype=jnp.float32)
            for kh in range(3):
                acc = acc + jnp.dot(p_ref[kh:kh + h1, :], b_ref[kh],
                                    preferred_element_type=jnp.float32)
            return jnp.maximum(acc, 0.0).astype(jnp.bfloat16)

        # conv1: input stored at rows [2, 2+h), lane offset 0 (pad baked in B).
        p1[2:2 + h, :] = x_ref[0].astype(jnp.bfloat16)
        a = conv_relu(p1, b1_ref)                 # (h1, w1*cu) bf16

        # conv2..conv4: activation at rows [1, 1+h1), lane offset 0.
        p2[1:1 + h1, :] = a
        a = conv_relu(p2, b2_ref)
        p3[1:1 + h1, :] = a
        a = conv_relu(p3, b3_ref)
        p4[1:1 + h1, :] = a
        a = conv_relu(p4, b4_ref)                 # (h1, w1*cu) bf16

        # Fused FC: one MXU push, block-diagonal mask (VPU), column reduce
        # (XLU), tiny regroup matmul (MXU), bias add.
        g = jnp.dot(a, wfc_ref[...], preferred_element_type=jnp.float32)   # (h1, h1*nact)
        v = jnp.sum(g * mask_ref[...], axis=0, keepdims=True)              # (1, h1*nact)
        out = jnp.dot(v, sel_ref[...], preferred_element_type=jnp.float32) + fcb_ref[...]
        o_ref[0] = out.astype(o_ref.dtype)

    return kernel


# ---------------------------------------------------------------------------
# Wrapper (per-call work: one tiny input relayout + the pallas_call)
# ---------------------------------------------------------------------------
def net_forward(prepped, x_nchw):
    """Forward pass equivalent to Net.forward (input NCHW, like PyTorch)."""
    n, cin, h, w = x_nchw.shape
    h1, w1 = h + 2, w + 2          # spatial size after conv1 (pad=2), then constant
    hp = h + 4                     # rows of the padded buffers (= h1 + 2)
    cu = prepped["b2"].shape[-1] // w1
    nact = prepped["fcb"].shape[-1]

    # Lane-dense (H, W*Cin) input layout (one tiny relayout per call).
    x2 = jnp.transpose(x_nchw, (0, 2, 3, 1)).reshape(n, h, w * cin)

    kernel = _make_fused_kernel(h, w, cin, cu, h1, w1, nact)

    out = pl.pallas_call(
        kernel,
        out_shape=jax.ShapeDtypeStruct((n, 1, nact), jnp.float32),
        grid=(n,),
        in_specs=[
            pl.BlockSpec((1, h, w * cin), lambda i: (i, 0, 0)),
            pl.BlockSpec((3, w * cin, w1 * cu), lambda i: (0, 0, 0)),
            pl.BlockSpec((3, w1 * cu, w1 * cu), lambda i: (0, 0, 0)),
            pl.BlockSpec((3, w1 * cu, w1 * cu), lambda i: (0, 0, 0)),
            pl.BlockSpec((3, w1 * cu, w1 * cu), lambda i: (0, 0, 0)),
            pl.BlockSpec((w1 * cu, h1 * nact), lambda i: (0, 0)),
            pl.BlockSpec((h1, h1 * nact), lambda i: (0, 0)),
            pl.BlockSpec((h1 * nact, nact), lambda i: (0, 0)),
            pl.BlockSpec((1, nact), lambda i: (0, 0)),
        ],
        out_specs=pl.BlockSpec((1, 1, nact), lambda i: (i, 0, 0)),
        scratch_shapes=[
            pltpu.VMEM((hp, w * cin), jnp.bfloat16),     # padded conv1 input
            pltpu.VMEM((hp, w1 * cu), jnp.bfloat16),     # padded conv2 input
            pltpu.VMEM((hp, w1 * cu), jnp.bfloat16),     # padded conv3 input
            pltpu.VMEM((hp, w1 * cu), jnp.bfloat16),     # padded conv4 input
        ],
        compiler_params=pltpu.CompilerParams(
            dimension_semantics=("parallel",)),          # batch -> 2 TCs on v7x
    )(x2, prepped["b1"], prepped["b2"], prepped["b3"], prepped["b4"],
      prepped["wfc"], prepped["mask"], prepped["sel"], prepped["fcb"])
    return out[:, 0, :]


# ---------------------------------------------------------------------------
# Pure-JAX f32 reference (for correctness check only)
# ---------------------------------------------------------------------------
def reference_forward(params, x_nchw):
    def conv(x, w_hwio, pad):
        return lax.conv_general_dilated(
            x, w_hwio, window_strides=(1, 1),
            padding=((pad, pad), (pad, pad)),
            dimension_numbers=("NCHW", "HWIO", "NCHW"))
    x = jax.nn.relu(conv(x_nchw, params["w1"], 2))
    x = jax.nn.relu(conv(x, params["w2"], 1))
    x = jax.nn.relu(conv(x, params["w3"], 1))
    x = jax.nn.relu(conv(x, params["w4"], 1))
    x = x.reshape(x.shape[0], -1)                        # NCHW flatten, like nn.Flatten
    return x @ params["fc_w"] + params["fc_b"]


# ---------------------------------------------------------------------------
# Deterministic parameter init + demo
# ---------------------------------------------------------------------------
def init_params(key, input_dims, n_actions, conv_units, in_channels):
    ks = jax.random.split(key, 6)

    def w(k, shape, fan_in):
        return (jax.random.uniform(k, shape, jnp.float32, -1.0, 1.0)
                / jnp.sqrt(jnp.float32(fan_in)))

    fc_size = conv_units * (input_dims[-1] + 2) * (input_dims[-2] + 2)
    return {
        "w1": w(ks[0], (3, 3, in_channels, conv_units), 9 * in_channels),
        "w2": w(ks[1], (3, 3, conv_units, conv_units), 9 * conv_units),
        "w3": w(ks[2], (3, 3, conv_units, conv_units), 9 * conv_units),
        "w4": w(ks[3], (3, 3, conv_units, conv_units), 9 * conv_units),
        "fc_w": w(ks[4], (fc_size, n_actions), fc_size),
        "fc_b": w(ks[5], (n_actions,), fc_size),
    }


if __name__ == "__main__":
    batch = 2
    in_channels = 4
    input_dims = (16, 16)     # (H, W)
    conv_units = 8
    n_actions = 6

    key = jax.random.PRNGKey(0)
    k_params, k_x = jax.random.split(key)
    params = init_params(k_params, input_dims, n_actions, conv_units, in_channels)
    x = jax.random.normal(
        k_x, (batch, in_channels, input_dims[0], input_dims[1]), jnp.float32)

    # One-time weight layout/cast work (outside the per-step jit).
    prepped = prepare_params(params, input_dims)

    fwd = jax.jit(net_forward)
    out = jax.block_until_ready(fwd(prepped, x))
    ref = jax.block_until_ready(reference_forward(params, x))

    assert out.shape == (batch, n_actions), out.shape
    # bf16 weights/activations -> slightly looser tolerance than pure f32.
    assert jnp.allclose(out, ref, atol=1e-2, rtol=1e-2), (
        float(jnp.max(jnp.abs(out - ref))))
    print("KERNEL_OK")
</pallas_src>

<mosaic_0001>
module attributes {stable_mosaic.version = 11 : i64} {
  func.func @kernel(%arg0: i32, %arg1: memref<1x16x64xf32, #tpu.memory_space<vmem>>, %arg2: memref<3x64x144xbf16, #tpu.memory_space<vmem>>, %arg3: memref<3x144x144xbf16, #tpu.memory_space<vmem>>, %arg4: memref<3x144x144xbf16, #tpu.memory_space<vmem>>, %arg5: memref<3x144x144xbf16, #tpu.memory_space<vmem>>, %arg6: memref<144x108xbf16, #tpu.memory_space<vmem>>, %arg7: memref<18x108xf32, #tpu.memory_space<vmem>>, %arg8: memref<108x6xf32, #tpu.memory_space<vmem>>, %arg9: memref<1x6xf32, #tpu.memory_space<vmem>>, %arg10: memref<1x1x6xf32, #tpu.memory_space<vmem>>, %arg11: memref<20x64xbf16, #tpu.memory_space<vmem>>, %arg12: memref<20x144xbf16, #tpu.memory_space<vmem>>, %arg13: memref<20x144xbf16, #tpu.memory_space<vmem>>, %arg14: memref<20x144xbf16, #tpu.memory_space<vmem>>) attributes {dimension_semantics = [#tpu.dimension_semantics<parallel>], iteration_bounds = array<i64: 2>, scalar_prefetch = 0 : i64, scratch_operands = 4 : i64, tpu.core_type = #tpu.core_type<tc>, window_params = [{transform_indices = @transform_0, window_bounds = array<i64: 1, 16, 64>}, {pipeline_mode = #tpu.pipeline_mode<synchronous>, transform_indices = @transform_1, window_bounds = array<i64: 3, 64, 144>}, {pipeline_mode = #tpu.pipeline_mode<synchronous>, transform_indices = @transform_2, window_bounds = array<i64: 3, 144, 144>}, {pipeline_mode = #tpu.pipeline_mode<synchronous>, transform_indices = @transform_3, window_bounds = array<i64: 3, 144, 144>}, {pipeline_mode = #tpu.pipeline_mode<synchronous>, transform_indices = @transform_4, window_bounds = array<i64: 3, 144, 144>}, {pipeline_mode = #tpu.pipeline_mode<synchronous>, transform_indices = @transform_5, window_bounds = array<i64: 144, 108>}, {pipeline_mode = #tpu.pipeline_mode<synchronous>, transform_indices = @transform_6, window_bounds = array<i64: 18, 108>}, {pipeline_mode = #tpu.pipeline_mode<synchronous>, transform_indices = @transform_7, window_bounds = array<i64: 108, 6>}, {pipeline_mode = #tpu.pipeline_mode<synchronous>, transform_indices = @transform_8, window_bounds = array<i64: 1, 6>}, {transform_indices = @transform_9, window_bounds = array<i64: 1, 1, 6>}]} {
    %cst = arith.constant 0.000000e+00 : bf16
    %0 = vector.broadcast %cst : bf16 to vector<2x64xbf16>
    %c0 = arith.constant 0 : index
    %c0_0 = arith.constant 0 : index
    %1 = vector.load %arg11[%c0, %c0_0] : memref<20x64xbf16, #tpu.memory_space<vmem>>, vector<2x64xbf16>
    tpu.vector_store %arg11[%c0, %c0_0], %0 {strides = array<i32>} : memref<20x64xbf16, #tpu.memory_space<vmem>>, vector<2x64xbf16>,
    %c18 = arith.constant 18 : index
    %c0_1 = arith.constant 0 : index
    %2 = vector.load %arg11[%c18, %c0_1] : memref<20x64xbf16, #tpu.memory_space<vmem>>, vector<2x64xbf16>
    tpu.vector_store %arg11[%c18, %c0_1], %0 {strides = array<i32>} : memref<20x64xbf16, #tpu.memory_space<vmem>>, vector<2x64xbf16>,
    %cst_2 = arith.constant 0.000000e+00 : bf16
    %3 = vector.broadcast %cst_2 : bf16 to vector<1x144xbf16>
    %c0_3 = arith.constant 0 : index
    %c0_4 = arith.constant 0 : index
    %4 = vector.load %arg12[%c0_3, %c0_4] : memref<20x144xbf16, #tpu.memory_space<vmem>>, vector<1x144xbf16>
    tpu.vector_store %arg12[%c0_3, %c0_4], %3 {strides = array<i32>} : memref<20x144xbf16, #tpu.memory_space<vmem>>, vector<1x144xbf16>,
    %c19 = arith.constant 19 : index
    %c0_5 = arith.constant 0 : index
    %5 = vector.load %arg12[%c19, %c0_5] : memref<20x144xbf16, #tpu.memory_space<vmem>>, vector<1x144xbf16>
    tpu.vector_store %arg12[%c19, %c0_5], %3 {strides = array<i32>} : memref<20x144xbf16, #tpu.memory_space<vmem>>, vector<1x144xbf16>,
    %c0_6 = arith.constant 0 : index
    %c0_7 = arith.constant 0 : index
    %6 = vector.load %arg13[%c0_6, %c0_7] : memref<20x144xbf16, #tpu.memory_space<vmem>>, vector<1x144xbf16>
    tpu.vector_store %arg13[%c0_6, %c0_7], %3 {strides = array<i32>} : memref<20x144xbf16, #tpu.memory_space<vmem>>, vector<1x144xbf16>,
    %c19_8 = arith.constant 19 : index
    %c0_9 = arith.constant 0 : index
    %7 = vector.load %arg13[%c19_8, %c0_9] : memref<20x144xbf16, #tpu.memory_space<vmem>>, vector<1x144xbf16>
    tpu.vector_store %arg13[%c19_8, %c0_9], %3 {strides = array<i32>} : memref<20x144xbf16, #tpu.memory_space<vmem>>, vector<1x144xbf16>,
    %c0_10 = arith.constant 0 : index
    %c0_11 = arith.constant 0 : index
    %8 = vector.load %arg14[%c0_10, %c0_11] : memref<20x144xbf16, #tpu.memory_space<vmem>>, vector<1x144xbf16>
    tpu.vector_store %arg14[%c0_10, %c0_11], %3 {strides = array<i32>} : memref<20x144xbf16, #tpu.memory_space<vmem>>, vector<1x144xbf16>,
    %c19_12 = arith.constant 19 : index
    %c0_13 = arith.constant 0 : index
    %9 = vector.load %arg14[%c19_12, %c0_13] : memref<20x144xbf16, #tpu.memory_space<vmem>>, vector<1x144xbf16>
    tpu.vector_store %arg14[%c19_12, %c0_13], %3 {strides = array<i32>} : memref<20x144xbf16, #tpu.memory_space<vmem>>, vector<1x144xbf16>,
    %c0_14 = arith.constant 0 : index
    %c0_15 = arith.constant 0 : index
    %c0_16 = arith.constant 0 : index
    %10 = vector.load %arg1[%c0_14, %c0_15, %c0_16] : memref<1x16x64xf32, #tpu.memory_space<vmem>>, vector<1x16x64xf32>
    %11 = vector.shape_cast %10 : vector<1x16x64xf32> to vector<16x64xf32>
    %12 = arith.truncf %11 : vector<16x64xf32> to vector<16x64xbf16>
    %c2 = arith.constant 2 : index
    %c0_17 = arith.constant 0 : index
    %13 = vector.load %arg11[%c2, %c0_17] : memref<20x64xbf16, #tpu.memory_space<vmem>>, vector<16x64xbf16>
    tpu.vector_store %arg11[%c2, %c0_17], %12 {strides = array<i32>} : memref<20x64xbf16, #tpu.memory_space<vmem>>, vector<16x64xbf16>,
    %cst_18 = arith.constant 0.000000e+00 : f32
    %14 = vector.broadcast %cst_18 : f32 to vector<18x144xf32>
    %c0_19 = arith.constant 0 : index
    %c0_20 = arith.constant 0 : index
    %15 = vector.load %arg11[%c0_19, %c0_20] : memref<20x64xbf16, #tpu.memory_space<vmem>>, vector<18x64xbf16>
    %c0_21 = arith.constant 0 : index
    %c0_22 = arith.constant 0 : index
    %c0_23 = arith.constant 0 : index
    %16 = vector.load %arg2[%c0_21, %c0_22, %c0_23] : memref<3x64x144xbf16, #tpu.memory_space<vmem>>, vector<1x64x144xbf16>
    %17 = vector.shape_cast %16 : vector<1x64x144xbf16> to vector<64x144xbf16>
    %cst_24 = arith.constant dense<0.000000e+00> : vector<18x144xf32>
    %18 = tpu.matmul %15, %17, %cst_24 {dimension_numbers = #tpu.dot_dimension_numbers<[1], [0], [0], [1], [0, 0, 1, 1], [], []>} : vector<18x64xbf16>, vector<64x144xbf16>, vector<18x144xf32> -> vector<18x144xf32>
    %19 = arith.addf %14, %18 : vector<18x144xf32>
    %c1 = arith.constant 1 : index
    %c0_25 = arith.constant 0 : index
    %20 = vector.load %arg11[%c1, %c0_25] : memref<20x64xbf16, #tpu.memory_space<vmem>>, vector<18x64xbf16>
    %c1_26 = arith.constant 1 : index
    %c0_27 = arith.constant 0 : index
    %c0_28 = arith.constant 0 : index
    %21 = vector.load %arg2[%c1_26, %c0_27, %c0_28] : memref<3x64x144xbf16, #tpu.memory_space<vmem>>, vector<1x64x144xbf16>
    %22 = vector.shape_cast %21 : vector<1x64x144xbf16> to vector<64x144xbf16>
    %cst_29 = arith.constant dense<0.000000e+00> : vector<18x144xf32>
    %23 = tpu.matmul %20, %22, %cst_29 {dimension_numbers = #tpu.dot_dimension_numbers<[1], [0], [0], [1], [0, 0, 1, 1], [], []>} : vector<18x64xbf16>, vector<64x144xbf16>, vector<18x144xf32> -> vector<18x144xf32>
    %24 = arith.addf %19, %23 : vector<18x144xf32>
    %c2_30 = arith.constant 2 : index
    %c0_31 = arith.constant 0 : index
    %25 = vector.load %arg11[%c2_30, %c0_31] : memref<20x64xbf16, #tpu.memory_space<vmem>>, vector<18x64xbf16>
    %c2_32 = arith.constant 2 : index
    %c0_33 = arith.constant 0 : index
    %c0_34 = arith.constant 0 : index
    %26 = vector.load %arg2[%c2_32, %c0_33, %c0_34] : memref<3x64x144xbf16, #tpu.memory_space<vmem>>, vector<1x64x144xbf16>
    %27 = vector.shape_cast %26 : vector<1x64x144xbf16> to vector<64x144xbf16>
    %cst_35 = arith.constant dense<0.000000e+00> : vector<18x144xf32>
    %28 = tpu.matmul %25, %27, %cst_35 {dimension_numbers = #tpu.dot_dimension_numbers<[1], [0], [0], [1], [0, 0, 1, 1], [], []>} : vector<18x64xbf16>, vector<64x144xbf16>, vector<18x144xf32> -> vector<18x144xf32>
    %29 = arith.addf %24, %28 : vector<18x144xf32>
    %cst_36 = arith.constant 0.000000e+00 : f32
    %30 = vector.broadcast %cst_36 : f32 to vector<18x144xf32>
    %31 = arith.maximumf %29, %30 : vector<18x144xf32>
    %32 = arith.truncf %31 : vector<18x144xf32> to vector<18x144xbf16>
    %c1_37 = arith.constant 1 : index
    %c0_38 = arith.constant 0 : index
    %33 = vector.load %arg12[%c1_37, %c0_38] : memref<20x144xbf16, #tpu.memory_space<vmem>>, vector<18x144xbf16>
    tpu.vector_store %arg12[%c1_37, %c0_38], %32 {strides = array<i32>} : memref<20x144xbf16, #tpu.memory_space<vmem>>, vector<18x144xbf16>,
    %cst_39 = arith.constant 0.000000e+00 : f32
    %34 = vector.broadcast %cst_39 : f32 to vector<18x144xf32>
    %c0_40 = arith.constant 0 : index
    %c0_41 = arith.constant 0 : index
    %35 = vector.load %arg12[%c0_40, %c0_41] : memref<20x144xbf16, #tpu.memory_space<vmem>>, vector<18x144xbf16>
    %c0_42 = arith.constant 0 : index
    %c0_43 = arith.constant 0 : index
    %c0_44 = arith.constant 0 : index
    %36 = vector.load %arg3[%c0_42, %c0_43, %c0_44] : memref<3x144x144xbf16, #tpu.memory_space<vmem>>, vector<1x144x144xbf16>
    %37 = vector.shape_cast %36 : vector<1x144x144xbf16> to vector<144x144xbf16>
    %cst_45 = arith.constant dense<0.000000e+00> : vector<18x144xf32>
    %38 = tpu.matmul %35, %37, %cst_45 {dimension_numbers = #tpu.dot_dimension_numbers<[1], [0], [0], [1], [0, 0, 1, 1], [], []>} : vector<18x144xbf16>, vector<144x144xbf16>, vector<18x144xf32> -> vector<18x144xf32>
    %39 = arith.addf %34, %38 : vector<18x144xf32>
    %c1_46 = arith.constant 1 : index
    %c0_47 = arith.constant 0 : index
    %40 = vector.load %arg12[%c1_46, %c0_47] : memref<20x144xbf16, #tpu.memory_space<vmem>>, vector<18x144xbf16>
    %c1_48 = arith.constant 1 : index
    %c0_49 = arith.constant 0 : index
    %c0_50 = arith.constant 0 : index
    %41 = vector.load %arg3[%c1_48, %c0_49, %c0_50] : memref<3x144x144xbf16, #tpu.memory_space<vmem>>, vector<1x144x144xbf16>
    %42 = vector.shape_cast %41 : vector<1x144x144xbf16> to vector<144x144xbf16>
    %cst_51 = arith.constant dense<0.000000e+00> : vector<18x144xf32>
    %43 = tpu.matmul %40, %42, %cst_51 {dimension_numbers = #tpu.dot_dimension_numbers<[1], [0], [0], [1], [0, 0, 1, 1], [], []>} : vector<18x144xbf16>, vector<144x144xbf16>, vector<18x144xf32> -> vector<18x144xf32>
    %44 = arith.addf %39, %43 : vector<18x144xf32>
    %c2_52 = arith.constant 2 : index
    %c0_53 = arith.constant 0 : index
    %45 = vector.load %arg12[%c2_52, %c0_53] : memref<20x144xbf16, #tpu.memory_space<vmem>>, vector<18x144xbf16>
    %c2_54 = arith.constant 2 : index
    %c0_55 = arith.constant 0 : index
    %c0_56 = arith.constant 0 : index
    %46 = vector.load %arg3[%c2_54, %c0_55, %c0_56] : memref<3x144x144xbf16, #tpu.memory_space<vmem>>, vector<1x144x144xbf16>
    %47 = vector.shape_cast %46 : vector<1x144x144xbf16> to vector<144x144xbf16>
    %cst_57 = arith.constant dense<0.000000e+00> : vector<18x144xf32>
    %48 = tpu.matmul %45, %47, %cst_57 {dimension_numbers = #tpu.dot_dimension_numbers<[1], [0], [0], [1], [0, 0, 1, 1], [], []>} : vector<18x144xbf16>, vector<144x144xbf16>, vector<18x144xf32> -> vector<18x144xf32>
    %49 = arith.addf %44, %48 : vector<18x144xf32>
    %cst_58 = arith.constant 0.000000e+00 : f32
    %50 = vector.broadcast %cst_58 : f32 to vector<18x144xf32>
    %51 = arith.maximumf %49, %50 : vector<18x144xf32>
    %52 = arith.truncf %51 : vector<18x144xf32> to vector<18x144xbf16>
    %c1_59 = arith.constant 1 : index
    %c0_60 = arith.constant 0 : index
    %53 = vector.load %arg13[%c1_59, %c0_60] : memref<20x144xbf16, #tpu.memory_space<vmem>>, vector<18x144xbf16>
    tpu.vector_store %arg13[%c1_59, %c0_60], %52 {strides = array<i32>} : memref<20x144xbf16, #tpu.memory_space<vmem>>, vector<18x144xbf16>,
    %cst_61 = arith.constant 0.000000e+00 : f32
    %54 = vector.broadcast %cst_61 : f32 to vector<18x144xf32>
    %c0_62 = arith.constant 0 : index
    %c0_63 = arith.constant 0 : index
    %55 = vector.load %arg13[%c0_62, %c0_63] : memref<20x144xbf16, #tpu.memory_space<vmem>>, vector<18x144xbf16>
    %c0_64 = arith.constant 0 : index
    %c0_65 = arith.constant 0 : index
    %c0_66 = arith.constant 0 : index
    %56 = vector.load %arg4[%c0_64, %c0_65, %c0_66] : memref<3x144x144xbf16, #tpu.memory_space<vmem>>, vector<1x144x144xbf16>
    %57 = vector.shape_cast %56 : vector<1x144x144xbf16> to vector<144x144xbf16>
    %cst_67 = arith.constant dense<0.000000e+00> : vector<18x144xf32>
    %58 = tpu.matmul %55, %57, %cst_67 {dimension_numbers = #tpu.dot_dimension_numbers<[1], [0], [0], [1], [0, 0, 1, 1], [], []>} : vector<18x144xbf16>, vector<144x144xbf16>, vector<18x144xf32> -> vector<18x144xf32>
    %59 = arith.addf %54, %58 : vector<18x144xf32>
    %c1_68 = arith.constant 1 : index
    %c0_69 = arith.constant 0 : index
    %60 = vector.load %arg13[%c1_68, %c0_69] : memref<20x144xbf16, #tpu.memory_space<vmem>>, vector<18x144xbf16>
    %c1_70 = arith.constant 1 : index
    %c0_71 = arith.constant 0 : index
    %c0_72 = arith.constant 0 : index
    %61 = vector.load %arg4[%c1_70, %c0_71, %c0_72] : memref<3x144x144xbf16, #tpu.memory_space<vmem>>, vector<1x144x144xbf16>
    %62 = vector.shape_cast %61 : vector<1x144x144xbf16> to vector<144x144xbf16>
    %cst_73 = arith.constant dense<0.000000e+00> : vector<18x144xf32>
    %63 = tpu.matmul %60, %62, %cst_73 {dimension_numbers = #tpu.dot_dimension_numbers<[1], [0], [0], [1], [0, 0, 1, 1], [], []>} : vector<18x144xbf16>, vector<144x144xbf16>, vector<18x144xf32> -> vector<18x144xf32>
    %64 = arith.addf %59, %63 : vector<18x144xf32>
    %c2_74 = arith.constant 2 : index
    %c0_75 = arith.constant 0 : index
    %65 = vector.load %arg13[%c2_74, %c0_75] : memref<20x144xbf16, #tpu.memory_space<vmem>>, vector<18x144xbf16>
    %c2_76 = arith.constant 2 : index
    %c0_77 = arith.constant 0 : index
    %c0_78 = arith.constant 0 : index
    %66 = vector.load %arg4[%c2_76, %c0_77, %c0_78] : memref<3x144x144xbf16, #tpu.memory_space<vmem>>, vector<1x144x144xbf16>
    %67 = vector.shape_cast %66 : vector<1x144x144xbf16> to vector<144x144xbf16>
    %cst_79 = arith.constant dense<0.000000e+00> : vector<18x144xf32>
    %68 = tpu.matmul %65, %67, %cst_79 {dimension_numbers = #tpu.dot_dimension_numbers<[1], [0], [0], [1], [0, 0, 1, 1], [], []>} : vector<18x144xbf16>, vector<144x144xbf16>, vector<18x144xf32> -> vector<18x144xf32>
    %69 = arith.addf %64, %68 : vector<18x144xf32>
    %cst_80 = arith.constant 0.000000e+00 : f32
    %70 = vector.broadcast %cst_80 : f32 to vector<18x144xf32>
    %71 = arith.maximumf %69, %70 : vector<18x144xf32>
    %72 = arith.truncf %71 : vector<18x144xf32> to vector<18x144xbf16>
    %c1_81 = arith.constant 1 : index
    %c0_82 = arith.constant 0 : index
    %73 = vector.load %arg14[%c1_81, %c0_82] : memref<20x144xbf16, #tpu.memory_space<vmem>>, vector<18x144xbf16>
    tpu.vector_store %arg14[%c1_81, %c0_82], %72 {strides = array<i32>} : memref<20x144xbf16, #tpu.memory_space<vmem>>, vector<18x144xbf16>,
    %cst_83 = arith.constant 0.000000e+00 : f32
    %74 = vector.broadcast %cst_83 : f32 to vector<18x144xf32>
    %c0_84 = arith.constant 0 : index
    %c0_85 = arith.constant 0 : index
    %75 = vector.load %arg14[%c0_84, %c0_85] : memref<20x144xbf16, #tpu.memory_space<vmem>>, vector<18x144xbf16>
    %c0_86 = arith.constant 0 : index
    %c0_87 = arith.constant 0 : index
    %c0_88 = arith.constant 0 : index
    %76 = vector.load %arg5[%c0_86, %c0_87, %c0_88] : memref<3x144x144xbf16, #tpu.memory_space<vmem>>, vector<1x144x144xbf16>
    %77 = vector.shape_cast %76 : vector<1x144x144xbf16> to vector<144x144xbf16>
    %cst_89 = arith.constant dense<0.000000e+00> : vector<18x144xf32>
    %78 = tpu.matmul %75, %77, %cst_89 {dimension_numbers = #tpu.dot_dimension_numbers<[1], [0], [0], [1], [0, 0, 1, 1], [], []>} : vector<18x144xbf16>, vector<144x144xbf16>, vector<18x144xf32> -> vector<18x144xf32>
    %79 = arith.addf %74, %78 : vector<18x144xf32>
    %c1_90 = arith.constant 1 : index
    %c0_91 = arith.constant 0 : index
    %80 = vector.load %arg14[%c1_90, %c0_91] : memref<20x144xbf16, #tpu.memory_space<vmem>>, vector<18x144xbf16>
    %c1_92 = arith.constant 1 : index
    %c0_93 = arith.constant 0 : index
    %c0_94 = arith.constant 0 : index
    %81 = vector.load %arg5[%c1_92, %c0_93, %c0_94] : memref<3x144x144xbf16, #tpu.memory_space<vmem>>, vector<1x144x144xbf16>
    %82 = vector.shape_cast %81 : vector<1x144x144xbf16> to vector<144x144xbf16>
    %cst_95 = arith.constant dense<0.000000e+00> : vector<18x144xf32>
    %83 = tpu.matmul %80, %82, %cst_95 {dimension_numbers = #tpu.dot_dimension_numbers<[1], [0], [0], [1], [0, 0, 1, 1], [], []>} : vector<18x144xbf16>, vector<144x144xbf16>, vector<18x144xf32> -> vector<18x144xf32>
    %84 = arith.addf %79, %83 : vector<18x144xf32>
    %c2_96 = arith.constant 2 : index
    %c0_97 = arith.constant 0 : index
    %85 = vector.load %arg14[%c2_96, %c0_97] : memref<20x144xbf16, #tpu.memory_space<vmem>>, vector<18x144xbf16>
    %c2_98 = arith.constant 2 : index
    %c0_99 = arith.constant 0 : index
    %c0_100 = arith.constant 0 : index
    %86 = vector.load %arg5[%c2_98, %c0_99, %c0_100] : memref<3x144x144xbf16, #tpu.memory_space<vmem>>, vector<1x144x144xbf16>
    %87 = vector.shape_cast %86 : vector<1x144x144xbf16> to vector<144x144xbf16>
    %cst_101 = arith.constant dense<0.000000e+00> : vector<18x144xf32>
    %88 = tpu.matmul %85, %87, %cst_101 {dimension_numbers = #tpu.dot_dimension_numbers<[1], [0], [0], [1], [0, 0, 1, 1], [], []>} : vector<18x144xbf16>, vector<144x144xbf16>, vector<18x144xf32> -> vector<18x144xf32>
    %89 = arith.addf %84, %88 : vector<18x144xf32>
    %cst_102 = arith.constant 0.000000e+00 : f32
    %90 = vector.broadcast %cst_102 : f32 to vector<18x144xf32>
    %91 = arith.maximumf %89, %90 : vector<18x144xf32>
    %92 = arith.truncf %91 : vector<18x144xf32> to vector<18x144xbf16>
    %c0_103 = arith.constant 0 : index
    %c0_104 = arith.constant 0 : index
    %93 = vector.load %arg6[%c0_103, %c0_104] : memref<144x108xbf16, #tpu.memory_space<vmem>>, vector<144x108xbf16>
    %cst_105 = arith.constant dense<0.000000e+00> : vector<18x108xf32>
    %94 = tpu.matmul %92, %93, %cst_105 {dimension_numbers = #tpu.dot_dimension_numbers<[1], [0], [0], [1], [0, 0, 1, 1], [], []>} : vector<18x144xbf16>, vector<144x108xbf16>, vector<18x108xf32> -> vector<18x108xf32>
    %c0_106 = arith.constant 0 : index
    %c0_107 = arith.constant 0 : index
    %95 = vector.load %arg7[%c0_106, %c0_107] : memref<18x108xf32, #tpu.memory_space<vmem>>, vector<18x108xf32>
    %96 = arith.mulf %94, %95 : vector<18x108xf32>
    %cst_108 = arith.constant dense<0.000000e+00> : vector<108xf32>
    %97 = vector.multi_reduction <add>, %96, %cst_108 [0] : vector<18x108xf32> to vector<108xf32>
    %98 = vector.shape_cast %97 : vector<108xf32> to vector<1x108xf32>
    %c0_109 = arith.constant 0 : index
    %c0_110 = arith.constant 0 : index
    %99 = vector.load %arg8[%c0_109, %c0_110] : memref<108x6xf32, #tpu.memory_space<vmem>>, vector<108x6xf32>
    %cst_111 = arith.constant dense<0.000000e+00> : vector<1x6xf32>
    %100 = tpu.matmul %98, %99, %cst_111 {dimension_numbers = #tpu.dot_dimension_numbers<[1], [0], [0], [1], [0, 0, 1, 1], [], []>} : vector<1x108xf32>, vector<108x6xf32>, vector<1x6xf32> -> vector<1x6xf32>
    %c0_112 = arith.constant 0 : index
    %c0_113 = arith.constant 0 : index
    %101 = vector.load %arg9[%c0_112, %c0_113] : memref<1x6xf32, #tpu.memory_space<vmem>>, vector<1x6xf32>
    %102 = arith.addf %100, %101 : vector<1x6xf32>
    %c0_114 = arith.constant 0 : index
    %c0_115 = arith.constant 0 : index
    %c0_116 = arith.constant 0 : index
    %103 = vector.load %arg10[%c0_114, %c0_115, %c0_116] : memref<1x1x6xf32, #tpu.memory_space<vmem>>, vector<1x1x6xf32>
    %104 = vector.shape_cast %103 : vector<1x1x6xf32> to vector<1x6xf32>
    %105 = vector.shape_cast %102 : vector<1x6xf32> to vector<1x1x6xf32>
    tpu.vector_store %arg10[%c0_114, %c0_115, %c0_116], %105 {strides = array<i32>} : memref<1x1x6xf32, #tpu.memory_space<vmem>>, vector<1x1x6xf32>,
    return
  }
  func.func @transform_0(%arg0: i32) -> (i32, i32, i32) {
    %c0_i32 = arith.constant 0 : i32
    %c0_i32_0 = arith.constant 0 : i32
    %c0_i32_1 = arith.constant 0 : i32
    return %arg0, %c0_i32, %c0_i32_0 : i32, i32, i32
  }
  func.func @transform_1(%arg0: i32) -> (i32, i32, i32) {
    %c0_i32 = arith.constant 0 : i32
    %c0_i32_0 = arith.constant 0 : i32
    %c0_i32_1 = arith.constant 0 : i32
    %c0_i32_2 = arith.constant 0 : i32
    return %c0_i32, %c0_i32_0, %c0_i32_1 : i32, i32, i32
  }
  func.func @transform_2(%arg0: i32) -> (i32, i32, i32) {
    %c0_i32 = arith.constant 0 : i32
    %c0_i32_0 = arith.constant 0 : i32
    %c0_i32_1 = arith.constant 0 : i32
    %c0_i32_2 = arith.constant 0 : i32
    return %c0_i32, %c0_i32_0, %c0_i32_1 : i32, i32, i32
  }
  func.func @transform_3(%arg0: i32) -> (i32, i32, i32) {
    %c0_i32 = arith.constant 0 : i32
    %c0_i32_0 = arith.constant 0 : i32
    %c0_i32_1 = arith.constant 0 : i32
    %c0_i32_2 = arith.constant 0 : i32
    return %c0_i32, %c0_i32_0, %c0_i32_1 : i32, i32, i32
  }
  func.func @transform_4(%arg0: i32) -> (i32, i32, i32) {
    %c0_i32 = arith.constant 0 : i32
    %c0_i32_0 = arith.constant 0 : i32
    %c0_i32_1 = arith.constant 0 : i32
    %c0_i32_2 = arith.constant 0 : i32
    return %c0_i32, %c0_i32_0, %c0_i32_1 : i32, i32, i32
  }
  func.func @transform_5(%arg0: i32) -> (i32, i32) {
    %c0_i32 = arith.constant 0 : i32
    %c0_i32_0 = arith.constant 0 : i32
    %c0_i32_1 = arith.constant 0 : i32
    return %c0_i32, %c0_i32_0 : i32, i32
  }
  func.func @transform_6(%arg0: i32) -> (i32, i32) {
    %c0_i32 = arith.constant 0 : i32
    %c0_i32_0 = arith.constant 0 : i32
    %c0_i32_1 = arith.constant 0 : i32
    return %c0_i32, %c0_i32_0 : i32, i32
  }
  func.func @transform_7(%arg0: i32) -> (i32, i32) {
    %c0_i32 = arith.constant 0 : i32
    %c0_i32_0 = arith.constant 0 : i32
    %c0_i32_1 = arith.constant 0 : i32
    return %c0_i32, %c0_i32_0 : i32, i32
  }
  func.func @transform_8(%arg0: i32) -> (i32, i32) {
    %c0_i32 = arith.constant 0 : i32
    %c0_i32_0 = arith.constant 0 : i32
    %c0_i32_1 = arith.constant 0 : i32
    return %c0_i32, %c0_i32_0 : i32, i32
  }
  func.func @transform_9(%arg0: i32) -> (i32, i32, i32) {
    %c0_i32 = arith.constant 0 : i32
    %c0_i32_0 = arith.constant 0 : i32
    %c0_i32_1 = arith.constant 0 : i32
    return %arg0, %c0_i32, %c0_i32_0 : i32, i32, i32
  }
}

</mosaic_0001>

<bundles_post_ra>
// kernel: net_forward.1
= control target key start
LH: loop header
LB: loop body
LE: loop exit
PB: predicated region body
PF: predicated region fallthrough
CT: control target
= control target key end

     0   :  { %14 = vsyncpa [#allocation7], 0  ;;  %s4601_s0 = inlined_call_operand.vmem [shape: f32[2,16,64], index: 0, kind: input, shape index: {}]   ;;  %s4602_s1 = inlined_call_operand.hbm [shape: bf16[3,64,144], index: 1, kind: input, shape index: {}]   ;;  %s4603_s2 = inlined_call_operand.vmem [shape: bf16[3,144,144], index: 2, kind: input, shape index: {}]   ;;  %s4604_s3 = inlined_call_operand.hbm [shape: bf16[3,144,144], index: 3, kind: input, shape index: {}]   ;;  %s4605_s4 = inlined_call_operand.hbm [shape: bf16[3,144,144], index: 4, kind: input, shape index: {}]   ;;  %s4606_s5 = inlined_call_operand.vmem [shape: bf16[144,108], index: 5, kind: input, shape index: {}]   ;;  %s4607_s6 = inlined_call_operand.vmem [shape: f32[18,108], index: 6, kind: input, shape index: {}]   ;;  %s4608_s7 = inlined_call_operand.vmem [shape: f32[108,6], index: 7, kind: input, shape index: {}]   ;;  %s4609_s8 = inlined_call_operand.vmem [shape: f32[1,6], index: 8, kind: input, shape index: {}]   ;;  %s4610_s9 = inlined_call_operand.hbm [shape: f32[2,1,6], index: 9, kind: output, shape index: {}]  }
   0x1   :  { %15 = vsyncpa [#allocation10], 0 }
   0x2   :  { %16 = vsyncpa [#allocation8], 0 }
   0x3   :  { %18 = vsyncpa [#allocation8 + $0x1], 0  ;;  %s4016_s30 = smov 0   ;;  %s4018_s10 = smov 0  }
   0x4   :  { %s4020_s11 = smov 0   ;;  %s4022_s12 = smov 0  }
   0x5 LB: > { %s4037_s13 = sadd.s32 4294967295, %s3955_s12   ;;  %s3053_s14 = sadd.s32 4294967294, %s3955_s12   ;;  %s3955_s12 = sphi %s4022_s12, %s4638_s12   ;;  %s3951_s11 = sphi %s4020_s11, %s4637_s11   ;;  %s3947_s10 = sphi %s4018_s10, %s4636_s10   ;;  %s3943_s30 = sphi %s4016_s30, %s4635_s30  }
   0x6   : > { %s4041_s15 = sadd.s32 1, %s3955_s12   ;;  %s225_s16 = sadd.s32 1, %s3951_s11 }
   0x7   : > { %s222_s17 = ssub.s32 %s3955_s12, %s4041_s15  ;;  %p235_p0 = scmp.ne.s32.totalorder %s3951_s11, %s3947_s10 }
   0x8   : > { %p223_p1 = scmp.eq.s32.totalorder %s222_s17, 0  ;;  %p236_p2 = scmp.eq.s32.totalorder %s4037_s13, 1 }
   0x9   : > { %p241_p3 = scmp.ne.s32.totalorder %s3947_s10, %s3943_s30  ;;  %p242_p4 = scmp.eq.s32.totalorder %s3053_s14, 1 }
   0xa   : > { %s4052_s18 = scalar_select %p223_p1, %s3951_s11, %s225_s16  }
   0xb   : > { %p4054_p5 = por %p236_p2, %p235_p0  ;;  %p4058_p6 = por %p242_p4, %p241_p3 }
   0xc   : > { %p3054_p7 = scmp.ge.s32.totalorder %s3955_s12, 1  ;;  %p249_p8 = scmp.lt.s32.totalorder %s3955_s12, 3 }
   0xd   : > { %s4613_s19 = scalar_select %p4054_p5, 1, 0 }
   0xe   : > { %s4614_s20 = scalar_select %p4058_p6, 1, 0 }
   0xf   : > { %p4611_p9 = scmp.eq.s32.totalorder %s4037_s13, 0  ;;  %p4065_p10 = pnand %p3054_p7, %p249_p8 }
  0x10   : > { %s3957_s22 = smov [#allocation9]   ;;  %s3958_s25 = smov [#allocation6]  }
  0x11   : > { %p3438_p11 = pneg %p4065_p10  ;;  %s277_s23 = sshll.u32 %s3957_s22, 4  ;;  %s278_s23 = int_to_ptr.vmem [resolvable:$true] %s277_s23 }
  0x12   : > { %s261_s26 = sshll.u32 %s3958_s25, 4  ;;  %s3959_s27 = smov [#allocation11]   ;;  %s262_s26 = int_to_ptr.vmem [resolvable:$true] %s261_s26 }
  0x13   : > { %p4073_p12 = pnand %p4611_p9, %p3438_p11  ;;  %s290_s28 = sshll.u32 %s3959_s27, 4  ;;  %s291_s28 = int_to_ptr.vmem [resolvable:$true] %s290_s28 }
  0x14   : > { %s3820_s29 = scalar_lea.vmem %s278_s23, 6912  ;;  %p3828_p3 = scmp.lt.s32.totalorder %s278_s23, %s278_s23 }
  0x15   : > { %p3811_p13 = pneg %p4073_p12  ;;  %p3821_p0 = scmp.ne.s32.totalorder %s278_s23, %s3820_s29 }
  0x16   : > { %p3829_p4 = scmp.lt.s32.totalorder %s3820_s29, %s3820_s29 }
  0x17   : > { %p3823_p1 = pnand %p3821_p0, %p3811_p13 }
  0x18   : > { %p3830_p7 = por %p3829_p4, %p3828_p3 }
  0x19   : > { %p3824_p2 = pneg %p3823_p1 }
  0x1b   : > { %p3831_p8 = pnand %p3830_p7, %p3824_p2 }
  0x1d   : > { %3834 = shalt.err (!%p3831_p8)
}
  0x1e   : > { %s3960_s14 = smov 128   ;;  %s3961_s16 = smov 8  }
  0x1f   : > { %3444 = dma.hbm_to_vmem [thread:$0]  (!%p4073_p12), %s4604_s3, 6912, %s278_s23, [#allocation10], %s3960_s14, %s3960_s14, %s3961_s16  }
  0x20   : > { %s3846_s25 = scalar_lea.vmem %s262_s26, 3072  ;;  %p3854_p9 = scmp.lt.s32.totalorder %s262_s26, %s262_s26 }
  0x21   : > { %p3847_p11 = scmp.ne.s32.totalorder %s262_s26, %s3846_s25  ;;  %p3855_p6 = scmp.lt.s32.totalorder %s3846_s25, %s3846_s25 }
  0x23   : > { %p3849_p0 = pnand %p3847_p11, %p3811_p13  ;;  %p3856_p3 = por %p3855_p6, %p3854_p9 }
  0x25   : > { %p3850_p1 = pneg %p3849_p0 }
  0x27   : > { %p3857_p2 = pnand %p3856_p3, %p3850_p1 }
  0x29   : > { %3860 = shalt.err (!%p3857_p2)
}
  0x2a   : > { %3441 = dma.hbm_to_vmem [thread:$0]  (!%p4073_p12), %s4602_s1, 3072, %s262_s26, [#allocation7], %s3960_s14, %s3960_s14, %s3961_s16  }
  0x2b   : > { %s3872_s23 = scalar_lea.vmem %s291_s28, 6912  ;;  %p3880_p11 = scmp.lt.s32.totalorder %s291_s28, %s291_s28 }
  0x2c   : > { %p3873_p4 = scmp.ne.s32.totalorder %s291_s28, %s3872_s23  ;;  %p3881_p0 = scmp.lt.s32.totalorder %s3872_s23, %s3872_s23 }
  0x2e   : > { %p3875_p7 = pnand %p3873_p4, %p3811_p13  ;;  %p3882_p5 = por %p3881_p0, %p3880_p11 }
  0x30   : > { %p3876_p8 = pneg %p3875_p7 }
  0x32   : > { %p3883_p6 = pnand %p3882_p5, %p3876_p8 }
  0x34   : > { %3886 = shalt.err (!%p3883_p6)
}
  0x35   : > { %3447 = dma.hbm_to_vmem [thread:$0]  (!%p4073_p12), %s4605_s4, 6912, %s291_s28, [#allocation10], %s3960_s14, %s3960_s14, %s3961_s16  }
  0x36   : > { %326 = sbr.rel (%p4065_p10) target bundleno = 1554 (0x612), region = 56  ;;  %p4617_p9 = scmp.eq.s32.totalorder (!%p4065_p10), %s4037_s13, 0 }
  0x3b   : > { %3930 = dma.done.wait (%p4617_p9), [#allocation7], 3072   ;;  %p4618_p13 = pmov %p4617_p9 }
  0x3c   : > { %p4619_p1 = pmov %p4617_p9 }
  0x3d   : > { %3932 = vsyncadd (%p4618_p13), [#allocation7], 4294964224 }
  0x3e   : > { %3934 = dma.done.wait (%p4619_p1), [#allocation10], 13824   ;;  %p4620_p5 = pmov %p4619_p1 }
  0x3f   : > { %vm375_vm0 = vcmask 516096   ;;  %v3962_v0 = vmov 0   ;;  %p369_p10 = scmp.lt.s32.totalorder %s4037_s13, 1  ;;  %v3499_v1 = vld [vmem:[#allocation6 + $0x74] ss:$8 sps:$4 sm:$0xff]   ;;  %vm379_vm1 = vcmask 1040384  }
  0x40   : > { %3936 = vsyncadd (%p4620_p5), [#allocation10], 4294953472  ;;  %558 = vmatprep.mubr.bf16.mxu0 %v3962_v0  ;;  %657 = vmatprep.mubr.bf16.mxu1 %v3962_v0  ;;  %376 = vst.msk [vmem:[#allocation2] sm:$0x1] %vm375_vm0, %v3962_v0  ;;  %v3501_v2 = vld [vmem:[#allocation6 + $0x70] ss:$8 sps:$4 sm:$0xff]  }
  0x41   : > { %534 = vmatprep.subr.bf16.mxu0 %v3499_v1  ;;  %v3502_v3 = vld [vmem:[#allocation6 + $0x34] ss:$8 sps:$4 sm:$0xff]   ;;  %v3504_v4 = vld [vmem:[#allocation6 + $0x30] ss:$8 sps:$4 sm:$0xff]   ;;  %s370_s21 = scalar_select %p369_p10, %s4037_s13, 1  ;;  %vm419_vm2 = vcmask 1044484  }
  0x42   : > { %535 = vmatpush1.bf16.msra.mxu0 %v3501_v2  ;;  %v3505_v5 = vld [vmem:[#allocation6 + $0x64] ss:$8 sps:$4 sm:$0xff]   ;;  %v3507_v6 = vld [vmem:[#allocation6 + $0x60] ss:$8 sps:$4 sm:$0xff]   ;;  %633 = vmatprep.subr.bf16.mxu1 %v3502_v3  ;;  %v3511_v9 = vld [vmem:[#allocation6 + $0x54] ss:$8 sps:$4 sm:$0xff]  }
  0x43   : > { %v3508_v7 = vld [vmem:[#allocation6 + $0x24] ss:$8 sps:$4 sm:$0xff]   ;;  %634 = vmatpush1.bf16.msra.mxu1 %v3504_v4  ;;  %536 = vmatprep.subr.bf16.mxu0 %v3505_v5  ;;  %v3510_v8 = vld [vmem:[#allocation6 + $0x20] ss:$8 sps:$4 sm:$0xff]   ;;  %s3366_s24 = sshll.u32 %s370_s21, 4  ;;  %vm429_vm3 = vcmask 519169   ;;  %vm420_vm4 = vmor %vm379_vm1, %vm419_vm2 }
  0x44   : > { %635 = vmatprep.subr.bf16.mxu1 %v3508_v7  ;;  %v3513_v10 = vld [vmem:[#allocation6 + $0x50] ss:$8 sps:$4 sm:$0xff]   ;;  %v3514_v11 = vld [vmem:[#allocation6 + $0x14] ss:$8 sps:$4 sm:$0xff]   ;;  %v3517_v12 = vld [vmem:[#allocation6 + $0x44] ss:$8 sps:$4 sm:$0xff]   ;;  %s373_s14 = scalar_lea.vmem %s4601_s0, %s3366_s24 }
  0x45   : > { %v3516_v13 = vld [vmem:[#allocation6 + $0x10] ss:$8 sps:$4 sm:$0xff]   ;;  %v3520_v14 = vld [vmem:[#allocation6 + $0x4] ss:$8 sps:$4 sm:$0xff]   ;;  %v3519_v15 = vld [vmem:[#allocation6 + $0x40] ss:$8 sps:$4 sm:$0xff]  }
  0x46   : > { %537 = vmatpush1.bf16.msra.mxu0 %v3507_v6  ;;  %v3525_v16 = vld [vmem:[#allocation6 + $0xb4] ss:$8 sps:$4 sm:$0xff]   ;;  %v411_v17 = vld [vmem:[%s373_s14] sm:$0xff]  ;;  %v3522_v19 = vld [vmem:[#allocation6] ss:$8 sps:$4 sm:$0xff]   ;;  %vm431_vm5 = vcmask 519168  }
  0x47   : > { %538 = vmatprep.subr.bf16.mxu0 %v3511_v9  ;;  %636 = vmatpush1.bf16.msra.mxu1 %v3510_v8  ;;  %v412_v18 = vld [vmem:[%s373_s14 + $0x8] sm:$0xff]  ;;  %v3367_v20 = vpack.c.bf16 %v411_v17, %v411_v17  ;;  %vm519_vm6 = vcmask 523264   ;;  %vm463_vm7 = vsmask.f32 7424  ;;  %v3530_v37 = vld [vmem:[#allocation6 + $0xa4] ss:$8 sps:$4 sm:$0xff]  }
  0x48   : > { %637 = vmatprep.subr.bf16.mxu1 %v3514_v11  ;;  %v3368_v21 = vpack.c.bf16 %v412_v18, %v412_v18  ;;  %v3523_v34 = vld [vmem:[#allocation6 + $0xb0] ss:$8 sps:$4 sm:$0xff]   ;;  %v3528_v41 = vld [vmem:[#allocation6 + $0xa0] ss:$8 sps:$4 sm:$0xff]   ;;  %v3533_v42 = vld [vmem:[#allocation6 + $0x94] ss:$8 sps:$4 sm:$0xff]  }
  0x49   : > { %v421_v22 = vrot.slane %v3367_v20, 7  ;;  %v3531_v45 = vld [vmem:[#allocation6 + $0x90] ss:$8 sps:$4 sm:$0xff]   ;;  %v3537_v47 = vld [vmem:[#allocation6 + $0x84] ss:$8 sps:$4 sm:$0xff]   ;;  %vm689_vm8 = vcmask 1046528  }
  0x4a   : > { %539 = vmatpush1.bf16.msra.mxu0 %v3513_v10  ;;  %v423_v23 = vrot.slane %v3368_v21, 7  ;;  %v3535_v49 = vld [vmem:[#allocation6 + $0x80] ss:$8 sps:$4 sm:$0xff]   ;;  %v3539_v54 = vld [vmem:[%s4603_s2 + $0x70] ss:$8 sps:$4 sm:$0xff]   ;;  %vm382_vm10 = vcmask 126980  }
  0x4b   : > { %540 = vmatprep.subr.bf16.mxu0 %v3517_v12  ;;  %638 = vmatpush1.bf16.msra.mxu1 %v3516_v13  ;;  %v422_v24 = vrot.slane %v421_v22, 4  ;;  %430 = vst.msk [vmem:[#allocation2] sm:$0xe] %vm429_vm3, %v421_v22  ;;  %v3541_v53 = vld [vmem:[%s4603_s2 + $0x74] ss:$8 sps:$4 sm:$0xff]   ;;  %vm389_vm15 = vcmask 1041409  }
  0x4c   : > { %639 = vmatprep.subr.bf16.mxu1 %v3520_v14  ;;  %v425_v25 = vrot.slane %v423_v23, 4  ;;  %v3544_v55 = vld [vmem:[%s4603_s2 + $0x64] ss:$8 sps:$4 sm:$0xff]   ;;  %v3542_v56 = vld [vmem:[%s4603_s2 + $0x60] ss:$8 sps:$4 sm:$0xff]   ;;  %s367_s23 = sand.u32 1, %s3947_s10  }
  0x4d   : > { %v424_v26 = vsel %vm420_vm4, %v422_v24, %v423_v23  ;;  %v3547_v57 = vld [vmem:[%s4603_s2 + $0x54] ss:$8 sps:$4 sm:$0xff]   ;;  %v3545_v58 = vld [vmem:[%s4603_s2 + $0x50] ss:$8 sps:$4 sm:$0xff]   ;;  %v3550_v59 = vld [vmem:[%s4603_s2 + $0x104] ss:$8 sps:$4 sm:$0xff]  }
  0x4e   : > { %541 = vmatpush1.bf16.msra.mxu0 %v3519_v15  ;;  %433 = vst.msk [vmem:[#allocation2 + $0x8] sm:$0x1] %vm375_vm0, %v425_v25  ;;  %vm380_vm9 = vsmask.f32 256  ;;  %vm383_vm11 = vsmask.f32 4352 }
  0x4f   : > { %747 = vmatprep.subr.bf16.mxu0 %v3525_v16  ;;  %640 = vmatpush1.bf16.msra.mxu1 %v3522_v19  ;;  %432 = vst.msk [vmem:[#allocation2 + $0x4] sm:$0xf] %vm431_vm5, %v424_v26  ;;  %vm381_vm12 = vmand %vm379_vm1, %vm380_vm9  ;;  %v386_v60 = vld [vmem:[#allocation3] sm:$0x11]  ;;  %v3548_v61 = vld [vmem:[%s4603_s2 + $0x100] ss:$8 sps:$4 sm:$0xff]  }
  0x50   : > { %1056 = vmatprep.subr.bf16.mxu1 %v3550_v59  ;;  %vm384_vm13 = vmand %vm382_vm10, %vm383_vm11  ;;  %v3553_v62 = vld [vmem:[%s4603_s2 + $0x44] ss:$8 sps:$4 sm:$0xff]   ;;  %v3551_v1 = vld [vmem:[%s4603_s2 + $0x40] ss:$8 sps:$4 sm:$0xff]   ;;  %vm390_vm0 = vsmask.f32 7942 }
  0x51   : > { %vm4165_vm14 = vmor %vm384_vm13, %vm381_vm12  ;;  %v3556_v2 = vld [vmem:[%s4603_s2 + $0xf4] ss:$8 sps:$4 sm:$0xff]   ;;  %v3554_v4 = vld [vmem:[%s4603_s2 + $0xf0] ss:$8 sps:$4 sm:$0xff]   ;;  %vm392_vm1 = vcmask 128005   ;;  %vm852_vm11 = vcmask 130052  }
  0x52   : > { %v434_v27 = vld [vmem:[#allocation2] sm:$0xf]  ;;  %v387_v3 = vsel %vm4165_vm14, 0, %v386_v60  ;;  %v3559_v5 = vld [vmem:[%s4603_s2 + $0x34] ss:$8 sps:$4 sm:$0xff]   ;;  %vm391_vm3 = vmand %vm389_vm15, %vm390_vm0  ;;  %s3363_s21 = sshll.u32 %s4037_s13, 4 }
  0x53   : > { %v676_v44 = vld [vmem:[#allocation2] sm:$0xe]  ;;  %388 = vst [vmem:[#allocation3] sm:$0x11] %v387_v3  ;;  %v3557_v6 = vld [vmem:[%s4603_s2 + $0x30] ss:$8 sps:$4 sm:$0xff]   ;;  %s4566_s16 = scalar_lea.hbm %s4610_s9, %s3363_s21 }
  0x54   : > { %v3562_v7 = vld [vmem:[%s4603_s2 + $0xe4] ss:$8 sps:$4 sm:$0xff]   ;;  %v3560_v8 = vld [vmem:[%s4603_s2 + $0xe0] ss:$8 sps:$4 sm:$0xff]   ;;  %vm393_vm2 = vsmask.f32 7958 }
  0x55   : > { %v3527_v28 = vld [vmem:[#allocation2 + $0x8] ss:$0 sps:$4 sm:$0x33]   ;;  %v3565_v10 = vld [vmem:[%s4603_s2 + $0x24] ss:$8 sps:$4 sm:$0xff]   ;;  %vm394_vm4 = vmand %vm392_vm1, %vm393_vm2  ;;  %vm863_vm2 = vcmask 1041408  }
  0x56   : > { %v435_v29 = vld [vmem:[#allocation2 + $0x4] sm:$0xf]  ;;  %v472_v31 = vshll.u32 %v3527_v28, 16  ;;  %v3534_v38 = vld [vmem:[#allocation2 + $0x8] ss:$0 sps:$4 sm:$0x11]   ;;  %vm4213_vm5 = vmor %vm394_vm4, %vm391_vm3 }
  0x57   : > { %v3067_v30 = vcombine.low %v434_v27, %v435_v29  ;;  %v476_v43 = vshrl.u32 %v3527_v28, 16  ;;  %v3090_v48 = vcombine.low %v676_v44, %v435_v29  ;;  %v691_v51 = vrot.slane %v3527_v28, 1  ;;  %v3563_v9 = vld [vmem:[%s4603_s2 + $0x20] ss:$8 sps:$4 sm:$0xff]   ;;  %v3566_v11 = vld [vmem:[%s4603_s2 + $0xd0] ss:$8 sps:$4 sm:$0xff]  }
  0x58   : > { %v474_v36 = vrot.slane %v472_v31, 1  ;;  %v3568_v12 = vld [vmem:[%s4603_s2 + $0xd4] ss:$8 sps:$4 sm:$0xff]   ;;  %v3569_v15 = vld [vmem:[%s4603_s2 + $0x10] ss:$8 sps:$4 sm:$0xff]   ;;  %s368_s24 = scalar_lea.vmem [#allocation12], %s367_s23 }
  0x59   : > { %v465_v32 = vshrl.u32 %v3067_v30, 16  ;;  %v467_v33 = vshll.u32 %v3067_v30, 16  ;;  %3088 = vmatmul.mubr.msk.bf16.vlgmr.msra.gmra.mxu1 %vm519_vm6, %v3067_v30  ;;  %v690_v50 = vrot.slane %v3090_v48, 1  ;;  %v396_v13 = vld [vmem:[#allocation3 + $0x10] sm:$0x22]  ;;  %s2967_s26 = sshll.u32 %s368_s24, 4  ;;  %s2968_s26 = int_to_ptr.vmem [resolvable:$true] %s2967_s26 }
  0x5a   : > { %667 = vmatprep.mubr.bf16.mxu1 %v3962_v0  ;;  %v478_v46 = vor.u32 %v476_v43, %v474_v36  ;;  %1057 = vmatpush1.bf16.msra.mxu1 %v3548_v61  ;;  %v3571_v14 = vld [vmem:[%s4603_s2 + $0x14] ss:$8 sps:$4 sm:$0xff]   ;;  %v3574_v16 = vld [vmem:[%s4603_s2 + $0xc4] ss:$8 sps:$4 sm:$0xff]   ;;  %v3572_v18 = vld [vmem:[%s4603_s2 + $0xc0] ss:$8 sps:$4 sm:$0xff]  }
  0x5b   : > { %v469_v35 = vrot.slane %v467_v33, 1  ;;  %v692_v52 = vsel %vm689_vm8, %v690_v50, %v691_v51  ;;  %1058 = vmatprep.subr.bf16.mxu1 %v3556_v2  ;;  %v397_v19 = vsel %vm4213_vm5, 0, %v396_v13  ;;  %v3575_v20 = vld [vmem:[%s4603_s2] ss:$8 sps:$4 sm:$0xff]   ;;  %v3577_v21 = vld [vmem:[%s4603_s2 + $0x4] ss:$8 sps:$4 sm:$0xff]  }
  0x5c   : > { %398 = vst [vmem:[#allocation3 + $0x10] sm:$0x22] %v397_v19  ;;  %v3578_v22 = vld [vmem:[%s4603_s2 + $0xb0] ss:$8 sps:$4 sm:$0xff]   ;;  %v3580_v23 = vld [vmem:[%s4603_s2 + $0xb4] ss:$8 sps:$4 sm:$0xff]  }
  0x5d   : > { %v470_v39 = vor.u32 %v469_v35, %v465_v32  ;;  %v3583_v24 = vld [vmem:[%s4603_s2 + $0x84] ss:$8 sps:$4 sm:$0xff]   ;;  %v3581_v25 = vld [vmem:[%s4603_s2 + $0x80] ss:$8 sps:$4 sm:$0xff]   ;;  %v3589_v28 = vld [vmem:[%s4603_s2 + $0x94] ss:$8 sps:$4 sm:$0xff]  }
  0x5e   : > { %1059 = vmatpush1.bf16.msra.mxu1 %v3554_v4  ;;  %v3586_v26 = vld [vmem:[%s4603_s2 + $0xa4] ss:$8 sps:$4 sm:$0xff]   ;;  %v3584_v27 = vld [vmem:[%s4603_s2 + $0xa0] ss:$8 sps:$4 sm:$0xff]   ;;  %v3587_v29 = vld [vmem:[%s4603_s2 + $0x90] ss:$8 sps:$4 sm:$0xff]  }
  0x5f   : > { %v475_v40 = vsel %vm463_vm7, %v470_v39, %v474_v36  ;;  %1060 = vmatprep.subr.bf16.mxu1 %v3562_v7  ;;  %v3593_v30 = vld [vmem:[%s4603_s2 + $0x114] ss:$8 sps:$4 sm:$0xff]   ;;  %v3591_v31 = vld [vmem:[%s4603_s2 + $0x110] ss:$8 sps:$4 sm:$0xff]   ;;  %vm850_vm10 = vsmask.f32 7938 }
  0x60   : > { %3077 = vmatmul.mubr.msk.bf16.vlgmr.msra.gmra.mxu0 %vm519_vm6, %v475_v40  ;;  %v3599_v32 = vld [vmem:[%s4603_s2 + $0x194] ss:$8 sps:$4 sm:$0xff]   ;;  %vm853_vm12 = vsmask.f32 7954  ;;  %vm819_vm1 = vsmask.f32 4368 }
  0x61   : > { %748 = vmatpush1.bf16.msra.mxu0 %v3523_v34  ;;  %568 = vmatprep.mubr.bf16.mxu0 %v3962_v0  ;;  %vm854_vm15 = vmand %vm852_vm11, %vm853_vm12  ;;  %vm864_vm3 = vsmask.f32 1280  ;;  %vm867_vm12 = vsmask.f32 5376  ;;  %v408_v63 = vld [vmem:[#allocation5 + $0x10] sm:$0x22] }
  0x62   : > { %749 = vmatprep.subr.bf16.mxu0 %v3530_v37  ;;  %3089 = vmatmul.mubr.msk.bf16.gmra.mxu1 %vm519_vm6, %v3534_v38  ;;  %vm4270_vm4 = vmor %vm380_vm9, %vm819_vm1  ;;  %v3754_v17 = vld [vmem:[#allocation11 + $0xb4] ss:$8 sps:$4 sm:$0xff]   ;;  %s2955_s25 = scalar_lea.sflag [#allocation8], %s367_s23  ;;  %s3887_s27 = scalar_lea.vmem %s2968_s26, 16 }
  0x63   : > { %1061 = vmatpush1.bf16.msra.mxu1 %v3560_v8  ;;  %p3888_p12 = scmp.ne.s32.totalorder %s2968_s26, %s3887_s27  ;;  %p4633_p3 = scmp.ne.s32.totalorder %s4613_s19, 0 }
  0x64   : > { %1062 = vmatprep.subr.bf16.mxu1 %v3568_v12  ;;  %s3965_s13 = smov [#allocation12]  }
  0x65   : > { %750 = vmatpush1.bf16.msra.mxu0 %v3528_v41  ;;  %p3889_p2 = pnand %p3888_p12, %p4633_p3  ;;  %s3891_s29 = sshll.u32 %s3965_s13, 4  ;;  %s3892_s29 = int_to_ptr.vmem [resolvable:$false] %s3891_s29 }
  0x66   : > { %751 = vmatprep.subr.bf16.mxu0 %v3533_v42  ;;  %s3893_s17 = scalar_lea.vmem %s3892_s29, 32  ;;  %p3894_p7 = scmp.lt.s32.totalorder %s2968_s26, %s3892_s29 }
  0x67   : > { %1063 = vmatpush1.bf16.msra.mxu1 %v3566_v11  ;;  %p3890_p4 = pneg %p3889_p2  ;;  %p3895_p8 = scmp.lt.s32.totalorder %s3893_s17, %s3887_s27 }
  0x68   : > { %3078 = vmatmul.mubr.msk.bf16.gmra.mxu0 %vm519_vm6, %v478_v46  ;;  %1064 = vmatprep.subr.bf16.mxu1 %v3574_v16 }
  0x69   : > { %752 = vmatpush1.bf16.msra.mxu0 %v3531_v45  ;;  %771 = vmatprep.mubr.bf16.mxu0 %v3962_v0  ;;  %p3896_p11 = por %p3895_p8, %p3894_p7 }
  0x6a   : > { %753 = vmatprep.subr.bf16.mxu0 %v3537_v47 }
  0x6b   : > { %1065 = vmatpush1.bf16.msra.mxu1 %v3572_v18  ;;  %p3897_p0 = pnand %p3896_p11, %p3890_p4 }
  0x6c   : > { %1066 = vmatprep.subr.bf16.mxu1 %v3580_v23 }
  0x6d   : > { %754 = vmatpush1.bf16.msra.mxu0 %v3535_v49 }
  0x6e   : > { %1209 = vmatprep.subr.bf16.mxu0 %v3541_v53 }
  0x6f   : > { %1067 = vmatpush1.bf16.msra.mxu1 %v3578_v22 }
  0x70   : > { %3099 = vmatmul.mubr.msk.bf16.vlgmr.msra.gmra.mxu0 %vm519_vm6, %v692_v52  ;;  %1068 = vmatprep.subr.bf16.mxu1 %v3586_v26 }
  0x71   : > { %781 = vmatprep.mubr.bf16.mxu0 %v3962_v0  ;;  %1210 = vmatpush1.bf16.msra.mxu0 %v3539_v54 }
  0x72   : > { %1211 = vmatprep.subr.bf16.mxu0 %v3544_v55 }
  0x73   : > { %1069 = vmatpush1.bf16.msra.mxu1 %v3584_v27 }
  0x74   : > { %1070 = vmatprep.subr.bf16.mxu1 %v3589_v28 }
  0x75   : > { %1212 = vmatpush1.bf16.msra.mxu0 %v3542_v56 }
  0x76   : > { %1213 = vmatprep.subr.bf16.mxu0 %v3547_v57 }
  0x77   : > { %1071 = vmatpush1.bf16.msra.mxu1 %v3587_v29 }
  0x78   : > { %3100 = vmatmul.mubr.msk.bf16.gmra.mxu0 %vm519_vm6, %v691_v51  ;;  %1086 = vmatprep.subr.bf16.mxu1 %v3593_v30  ;;  %vm849_vm6 = vcmask 1043456  }
  0x79   : > { %1214 = vmatpush1.bf16.msra.mxu0 %v3545_v58  ;;  %vm851_vm13 = vmand %vm849_vm6, %vm850_vm10  ;;  %vm866_vm10 = vcmask 128004  }
  0x7a   : > { %1215 = vmatprep.subr.bf16.mxu0 %v3553_v62  ;;  %vm4263_vm0 = vmor %vm854_vm15, %vm851_vm13 }
  0x7b   : > { %1087 = vmatpush2.bf16.msra.mxu1 %v3591_v31  ;;  %vm4276_vm13 = vmor %vm852_vm11, %vm849_vm6  ;;  %vm1049_vm11 = vcmask 130048  }
  0x7c   : > { %1389 = vmatprep.subr.bf16.mxu1 %v3599_v32  ;;  %vm865_vm15 = vmand %vm863_vm2, %vm864_vm3 }
  0x7d   : > { %1216 = vmatpush1.bf16.msra.mxu0 %v3551_v1  ;;  %vm868_vm9 = vmand %vm866_vm10, %vm867_vm12 }
  0x7e   : > { %1217 = vmatprep.subr.bf16.mxu0 %v3559_v5  ;;  %vm4285_vm1 = vmor %vm868_vm9, %vm865_vm15 }
  0x81   : > { %1218 = vmatpush1.bf16.msra.mxu0 %v3557_v6 }
  0x82   : > { %1219 = vmatprep.subr.bf16.mxu0 %v3565_v10 }
  0x85   : > { %1220 = vmatpush1.bf16.msra.mxu0 %v3563_v9 }
  0x86   : > { %1221 = vmatprep.subr.bf16.mxu0 %v3571_v14 }
  0x89   : > { %1222 = vmatpush1.bf16.msra.mxu0 %v3569_v15  ;;  %v856_v15 = vld [vmem:[#allocation3] sm:$0xff] }
  0x8a   : > { %1223 = vmatprep.subr.bf16.mxu0 %v3577_v21 }
  0x8d   : > { %1224 = vmatpush1.bf16.msra.mxu0 %v3575_v20 }
  0x8e   : > { %1239 = vmatprep.subr.bf16.mxu0 %v3583_v24 }
  0x91   : > { %1240 = vmatpush2.bf16.msra.mxu0 %v3581_v25 }
 0x119   : > { %v659_v33 = vpop.f32.mrf.mxu1 }
 0x11b   : > { %v661_v34 = vpop.f32.mrf.mxu1 }
 0x11d   : > { %v663_v35 = vpop.f32.mrf.mxu1 }
 0x11f   : > { %v665_v36 = vpop.f32.mrf.mxu1 }
 0x120   : > { %v560_v37 = vpop.f32.mrf.mxu0 }
 0x121   : > { %v660_v49 = vadd.f32 %v659_v33, %v560_v37 }
 0x122   : > { %v562_v38 = vpop.f32.mrf.mxu0  ;;  %v669_v39 = vpop.f32.mrf.mxu1 }
 0x123   : > { %v662_v51 = vadd.f32 %v661_v34, %v562_v38  ;;  %v870_v38 = vld [vmem:[#allocation3 + $0x10] sm:$0x33] }
 0x124   : > { %v564_v40 = vpop.f32.mrf.mxu0  ;;  %v671_v41 = vpop.f32.mrf.mxu1 }
 0x125   : > { %v664_v54 = vadd.f32 %v663_v35, %v564_v40 }
 0x126   : > { %v566_v42 = vpop.f32.mrf.mxu0  ;;  %v673_v43 = vpop.f32.mrf.mxu1 }
 0x127   : > { %v666_v57 = vadd.f32 %v665_v36, %v566_v42 }
 0x128   : > { %v570_v44 = vpop.f32.mrf.mxu0  ;;  %v674_v45 = vpop.f32.mrf.mxu1 }
 0x129   : > { %v670_v2 = vadd.f32 %v669_v39, %v570_v44 }
 0x12a   : > { %v572_v46 = vpop.f32.mrf.mxu0 }
 0x12b   : > { %v672_v4 = vadd.f32 %v671_v41, %v572_v46 }
 0x12c   : > { %v574_v47 = vpop.f32.mrf.mxu0 }
 0x12e   : > { %v575_v48 = vpop.f32.mrf.mxu0 }
 0x130   : > { %v773_v50 = vpop.f32.mrf.mxu0 }
 0x131   : > { %v790_v52 = vadd.f32 %v773_v50, %v660_v49 }
 0x132   : > { %v775_v53 = vpop.f32.mrf.mxu0 }
 0x133   : > { %v791_v55 = vadd.f32 %v775_v53, %v662_v51  ;;  %v796_v58 = vmax.f32 %v790_v52, 0.0 }
 0x134   : > { %v777_v56 = vpop.f32.mrf.mxu0 }
 0x135   : > { %v797_v59 = vmax.f32 %v791_v55, 0.0  ;;  %v792_v60 = vadd.f32 %v777_v56, %v664_v54 }
 0x136   : > { %v779_v61 = vpop.f32.mrf.mxu0 }
 0x137   : > { %v3369_v62 = vpack.c.bf16 %v797_v59, %v796_v58  ;;  %v793_v1 = vadd.f32 %v779_v61, %v666_v57  ;;  %v798_v6 = vmax.f32 %v792_v60, 0.0 }
 0x138   : > { %v783_v3 = vpop.f32.mrf.mxu0 }
 0x139   : > { %v822_v5 = vshrl.u32 %v3369_v62, 16  ;;  %v799_v7 = vmax.f32 %v793_v1, 0.0  ;;  %v794_v8 = vadd.f32 %v783_v3, %v670_v2  ;;  %v825_v11 = vshll.u32 %v3369_v62, 16  ;;  %v3597_v1 = vld [vmem:[%s4603_s2 + $0x190] ss:$8 sps:$4 sm:$0xff]  }
 0x13a   : > { %v785_v9 = vpop.f32.mrf.mxu0 }
 0x13b   : > { %v824_v10 = vrot.slane %v822_v5, 7  ;;  %v3370_v12 = vpack.c.bf16 %v799_v7, %v798_v6  ;;  %v795_v13 = vadd.f32 %v785_v9, %v672_v4  ;;  %v800_v20 = vmax.f32 %v794_v8, 0.0  ;;  %v3602_v5 = vld [vmem:[%s4603_s2 + $0x184] ss:$8 sps:$4 sm:$0xff]   ;;  %v3600_v6 = vld [vmem:[%s4603_s2 + $0x180] ss:$8 sps:$4 sm:$0xff]  }
 0x13c   : > { %v787_v16 = vpop.f32.mrf.mxu0  ;;  %v3605_v8 = vld [vmem:[%s4603_s2 + $0x174] ss:$8 sps:$4 sm:$0xff]  }
 0x13d   : > { %v827_v18 = vor.u32 %v825_v11, %v824_v10  ;;  %v830_v19 = vshrl.u32 %v3370_v12, 16  ;;  %v801_v21 = vmax.f32 %v795_v13, 0.0  ;;  %v833_v25 = vshll.u32 %v3370_v12, 16  ;;  %v3603_v12 = vld [vmem:[%s4603_s2 + $0x170] ss:$8 sps:$4 sm:$0xff]  }
 0x13e   : > { %v788_v22 = vpop.f32.mrf.mxu0  ;;  %v828_v28 = vrot.slane %v824_v10, 4  ;;  %v3610_v16 = vld [vmem:[%s4603_s2 + $0x164] ss:$8 sps:$4 sm:$0xff]  }
 0x13f   : > { %v857_v23 = vsel %vm4263_vm0, %v827_v18, %v856_v15  ;;  %v832_v24 = vrot.slane %v830_v19, 7  ;;  %v3371_v27 = vpack.c.bf16 %v801_v21, %v800_v20  ;;  %v3608_v19 = vld [vmem:[%s4603_s2 + $0x160] ss:$8 sps:$4 sm:$0xff]   ;;  %v3613_v20 = vld [vmem:[%s4603_s2 + $0x154] ss:$8 sps:$4 sm:$0xff]  }
 0x140   : > { %858 = vst [vmem:[#allocation3] sm:$0xff] %v857_v23  ;;  %v3611_v21 = vld [vmem:[%s4603_s2 + $0x150] ss:$8 sps:$4 sm:$0xff]   ;;  %v3616_v22 = vld [vmem:[%s4603_s2 + $0x144] ss:$8 sps:$4 sm:$0xff]  }
 0x141   : > { %v835_v29 = vor.u32 %v833_v25, %v832_v24  ;;  %v839_v31 = vshrl.u32 %v3371_v27, 16  ;;  %v842_v34 = vshll.u32 %v3371_v27, 16  ;;  %v837_v35 = vrot.slane %v832_v24, 4  ;;  %v3619_v24 = vld [vmem:[%s4603_s2 + $0x134] ss:$8 sps:$4 sm:$0xff]  }
 0x142   : > { %v3617_v25 = vld [vmem:[%s4603_s2 + $0x130] ss:$8 sps:$4 sm:$0xff]   ;;  %v3622_v27 = vld [vmem:[%s4603_s2 + $0x124] ss:$8 sps:$4 sm:$0xff]  }
 0x143   : > { %v836_v32 = vsel %vm4270_vm4, %v828_v28, %v835_v29  ;;  %v841_v33 = vrot.slane %v839_v31, 7  ;;  %v3620_v28 = vld [vmem:[%s4603_s2 + $0x120] ss:$8 sps:$4 sm:$0xff]   ;;  %v3625_v29 = vld [vmem:[%s4603_s2 + $0x1a4] ss:$8 sps:$4 sm:$0xff]  }
 0x144   : > { %862 = vst.msk [vmem:[#allocation3 + $0x8] sm:$0xff] %vm4276_vm13, %v836_v32  ;;  %v3623_v32 = vld [vmem:[%s4603_s2 + $0x1a0] ss:$8 sps:$4 sm:$0xff]  }
 0x145   : > { %v844_v36 = vor.u32 %v842_v34, %v841_v33 }
 0x147   : > { %v845_v39 = vsel %vm4270_vm4, %v837_v35, %v844_v36  ;;  %v1260_v7 = vld [vmem:[#allocation3] sm:$0xee] }
 0x148   : > { %v871_v40 = vsel %vm4285_vm1, %v845_v39, %v870_v38  ;;  %v3626_v36 = vld [vmem:[#allocation9 + $0x70] ss:$8 sps:$4 sm:$0xff]   ;;  %v3628_v38 = vld [vmem:[#allocation9 + $0x74] ss:$8 sps:$4 sm:$0xff]   ;;  %v3631_v39 = vld [vmem:[#allocation9 + $0x64] ss:$8 sps:$4 sm:$0xff]  }
 0x149   : > { %872 = vst [vmem:[#allocation3 + $0x10] sm:$0x33] %v871_v40  ;;  %v3629_v40 = vld [vmem:[#allocation9 + $0x60] ss:$8 sps:$4 sm:$0xff]  }
 0x14b   : > { %v4293_v41 = vld [vmem:[#allocation3 + $0x8] sm:$0xff] }
 0x14c   : > { %v3122_v42 = vcombine.low %v857_v23, %v4293_v41  ;;  %v3123_v43 = vcombine.high %v857_v23, %v4293_v41  ;;  %v3187_v9 = vcombine.high %v1260_v7, %v4293_v41  ;;  %v3614_v23 = vld [vmem:[%s4603_s2 + $0x140] ss:$8 sps:$4 sm:$0xff]   ;;  %v3186_v31 = vcombine.low %v1260_v7, %v4293_v41  ;;  %v3668_v7 = vld [vmem:[#allocation9 + $0x80] ss:$8 sps:$4 sm:$0xff]  }
 0x14d   : > { %v3634_v41 = vld [vmem:[#allocation9 + $0x54] ss:$8 sps:$4 sm:$0xff]  }
 0x14e   : > { %3166 = vmatprep.mubr.msk.bf16.mxu0 %vm1049_vm11, %v3123_v43  ;;  %v942_v44 = vshll.u32 %v3123_v43, 16  ;;  %v930_v45 = vshll.u32 %v3122_v42, 16  ;;  %v940_v53 = vshrl.u32 %v3123_v43, 16  ;;  %v928_v55 = vshrl.u32 %v3122_v42, 16  ;;  %v3637_v43 = vld [vmem:[#allocation9 + $0x104] ss:$8 sps:$4 sm:$0xff]  }
 0x14f   : > { %1242 = vmatmul.mubr.bf16.vlgmr.msra.gmra.mxu0 %v3122_v42  ;;  %v1288_v15 = vrot.slane %v3187_v9, 1  ;;  %v1285_v34 = vrot.slane %v3186_v31, 1  ;;  %v3632_v42 = vld [vmem:[#allocation9 + $0x50] ss:$8 sps:$4 sm:$0xff]   ;;  %1686 = vmatprep.subr.bf16.mxu0 %v3637_v43  ;;  %v3671_v9 = vld [vmem:[#allocation9 + $0xa0] ss:$8 sps:$4 sm:$0xff]  }
 0x150   : > { %v875_v46 = vld [vmem:[#allocation3 + $0x10] sm:$0x11]  ;;  %v944_v48 = vrot.slane %v942_v44, 1  ;;  %v932_v52 = vrot.slane %v930_v45, 1  ;;  %v399_v44 = vld [vmem:[#allocation4] sm:$0x11] }
 0x151   : > { %v894_v47 = vld [vmem:[#allocation3 + $0x10] sm:$0x33]  ;;  %v3147_v49 = vcombine.high %v875_v46, %v875_v46  ;;  %v3146_v57 = vcombine.low %v875_v46, %v875_v46  ;;  %v400_v46 = vsel %vm4165_vm14, 0, %v399_v44 }
 0x152   : > { %v4298_v50 = vcombine.low %v894_v47, %v894_v47  ;;  %v4300_v51 = vcombine.high %v894_v47, %v894_v47  ;;  %v945_v58 = vor.u32 %v944_v48, %v940_v53  ;;  %v933_v60 = vor.u32 %v932_v52, %v928_v55  ;;  %v3635_v45 = vld [vmem:[#allocation9 + $0x100] ss:$8 sps:$4 sm:$0xff]   ;;  %401 = vst [vmem:[#allocation4] sm:$0x11] %v400_v46  ;;  %v3640_v47 = vld [vmem:[#allocation9 + $0x44] ss:$8 sps:$4 sm:$0xff]  }
 0x153   : > { %3167 = vmatprep.mubr.msk.bf16.mxu0 %vm1049_vm11, %v3147_v49  ;;  %1687 = vmatpush1.bf16.msra.mxu0 %v3635_v45  ;;  %v3638_v48 = vld [vmem:[#allocation9 + $0x40] ss:$8 sps:$4 sm:$0xff]   ;;  %v3643_v49 = vld [vmem:[#allocation9 + $0xf4] ss:$8 sps:$4 sm:$0xff]   ;;  %v3644_v52 = vld [vmem:[#allocation9 + $0x30] ss:$8 sps:$4 sm:$0xff]  }
 0x154   : > { %v947_v54 = vshll.u32 %v4300_v51, 16  ;;  %v935_v56 = vshll.u32 %v4298_v50, 16  ;;  %v954_v62 = vshrl.u32 %v4300_v51, 16  ;;  %v951_v10 = vshrl.u32 %v4298_v50, 16  ;;  %1688 = vmatprep.subr.bf16.mxu0 %v3643_v49  ;;  %v3649_v53 = vld [vmem:[#allocation9 + $0xe4] ss:$8 sps:$4 sm:$0xff]  }
 0x155   : > { %v1289_v11 = vrot.slane %v4300_v51, 1  ;;  %v1286_v33 = vrot.slane %v4298_v50, 1  ;;  %v3641_v50 = vld [vmem:[#allocation9 + $0xf0] ss:$8 sps:$4 sm:$0xff]   ;;  %v3646_v51 = vld [vmem:[#allocation9 + $0x34] ss:$8 sps:$4 sm:$0xff]  }
 0x156   : > { %v949_v59 = vrot.slane %v947_v54, 1  ;;  %v937_v61 = vrot.slane %v935_v56, 1  ;;  %v3647_v54 = vld [vmem:[#allocation9 + $0xe0] ss:$8 sps:$4 sm:$0xff]   ;;  %v3652_v56 = vld [vmem:[#allocation9 + $0x24] ss:$8 sps:$4 sm:$0xff]  }
 0x157   : > { %1252 = vmatmul.mubr.bf16.gmra.mxu0 %v3146_v57  ;;  %v1290_v18 = vsel %vm689_vm8, %v1288_v15, %v1289_v11  ;;  %v1287_v35 = vsel %vm689_vm8, %v1285_v34, %v1286_v33  ;;  %v402_v55 = vld [vmem:[#allocation4 + $0x10] sm:$0x22]  ;;  %v3678_v15 = vld [vmem:[#allocation9 + $0x110] ss:$8 sps:$4 sm:$0xff]  }
 0x158   : > { %v950_v2 = vsel %vm463_vm7, %v945_v58, %v949_v59  ;;  %v938_v3 = vsel %vm463_vm7, %v933_v60, %v937_v61  ;;  %v956_v4 = vor.u32 %v954_v62, %v949_v59  ;;  %v953_v13 = vor.u32 %v951_v10, %v937_v61  ;;  %1689 = vmatpush1.bf16.msra.mxu0 %v3641_v50  ;;  %v3650_v58 = vld [vmem:[#allocation9 + $0x20] ss:$8 sps:$4 sm:$0xff]   ;;  %v3655_v59 = vld [vmem:[#allocation9 + $0xd4] ss:$8 sps:$4 sm:$0xff]   ;;  %v3653_v60 = vld [vmem:[#allocation9 + $0xd0] ss:$8 sps:$4 sm:$0xff]  }
 0x159   : > { %3144 = vmatprep.mubr.msk.bf16.mxu1 %vm1049_vm11, %v950_v2  ;;  %1690 = vmatprep.subr.bf16.mxu0 %v3649_v53  ;;  %v403_v57 = vsel %vm4213_vm5, 0, %v402_v55  ;;  %v3658_v61 = vld [vmem:[#allocation9 + $0x14] ss:$8 sps:$4 sm:$0xff]   ;;  %v3656_v62 = vld [vmem:[#allocation9 + $0x10] ss:$8 sps:$4 sm:$0xff]  }
 0x15a   : > { %1089 = vmatmul.mubr.bf16.vlgmr.msra.gmra.mxu1 %v938_v3  ;;  %404 = vst [vmem:[#allocation4 + $0x10] sm:$0x22] %v403_v57  ;;  %v3659_v2 = vld [vmem:[#allocation9 + $0xc0] ss:$8 sps:$4 sm:$0xff]   ;;  %v3664_v3 = vld [vmem:[#allocation9 + $0x4] ss:$8 sps:$4 sm:$0xff]  }
 0x15b   : > { %1390 = vmatpush1.bf16.msra.mxu1 %v3597_v1  ;;  %3145 = vmatprep.mubr.msk.bf16.mxu1 %vm1049_vm11, %v956_v4  ;;  %v3661_v1 = vld [vmem:[#allocation9 + $0xc4] ss:$8 sps:$4 sm:$0xff]   ;;  %v3662_v4 = vld [vmem:[#allocation9] ss:$8 sps:$4 sm:$0xff]  }
 0x15c   : > { %1391 = vmatprep.subr.bf16.mxu1 %v3602_v5  ;;  %1691 = vmatpush1.bf16.msra.mxu0 %v3647_v54  ;;  %v3667_v5 = vld [vmem:[#allocation9 + $0xb4] ss:$8 sps:$4 sm:$0xff]   ;;  %v3673_v10 = vld [vmem:[#allocation9 + $0xa4] ss:$8 sps:$4 sm:$0xff]  }
 0x15d   : > { %1692 = vmatprep.subr.bf16.mxu0 %v3655_v59 }
 0x15f   : > { %1392 = vmatpush1.bf16.msra.mxu1 %v3600_v6  ;;  %v3665_v6 = vld [vmem:[#allocation9 + $0xb0] ss:$8 sps:$4 sm:$0xff]  }
 0x160   : > { %1393 = vmatprep.subr.bf16.mxu1 %v3605_v8  ;;  %1693 = vmatpush1.bf16.msra.mxu0 %v3653_v60  ;;  %v3670_v8 = vld [vmem:[#allocation9 + $0x84] ss:$8 sps:$4 sm:$0xff]  }
 0x161   : > { %1694 = vmatprep.subr.bf16.mxu0 %v3661_v1 }
 0x162   : > { %1099 = vmatmul.mubr.bf16.gmra.mxu1 %v953_v13  ;;  %v3680_v13 = vld [vmem:[#allocation9 + $0x114] ss:$8 sps:$4 sm:$0xff]  }
 0x163   : > { %1394 = vmatpush1.bf16.msra.mxu1 %v3603_v12  ;;  %3206 = vmatprep.mubr.msk.bf16.mxu1 %vm1049_vm11, %v1290_v18  ;;  %v3676_v12 = vld [vmem:[#allocation9 + $0x94] ss:$8 sps:$4 sm:$0xff]  }
 0x164   : > { %1395 = vmatprep.subr.bf16.mxu1 %v3610_v16  ;;  %1695 = vmatpush1.bf16.msra.mxu0 %v3659_v2  ;;  %v3686_v16 = vld [vmem:[#allocation9 + $0x194] ss:$8 sps:$4 sm:$0xff]  }
 0x165   : > { %1696 = vmatprep.subr.bf16.mxu0 %v3667_v5  ;;  %v1497_v2 = vld [vmem:[#allocation4] sm:$0xff] }
 0x167   : > { %1396 = vmatpush1.bf16.msra.mxu1 %v3608_v19 }
 0x168   : > { %1397 = vmatprep.subr.bf16.mxu1 %v3613_v20  ;;  %1697 = vmatpush1.bf16.msra.mxu0 %v3665_v6 }
 0x169   : > { %1698 = vmatprep.subr.bf16.mxu0 %v3673_v10 }
 0x16b   : > { %1398 = vmatpush1.bf16.msra.mxu1 %v3611_v21 }
 0x16c   : > { %1399 = vmatprep.subr.bf16.mxu1 %v3616_v22  ;;  %1699 = vmatpush1.bf16.msra.mxu0 %v3671_v9 }
 0x16d   : > { %1700 = vmatprep.subr.bf16.mxu0 %v3676_v12 }
 0x16f   : > { %1400 = vmatpush1.bf16.msra.mxu1 %v3614_v23 }
 0x170   : > { %1401 = vmatprep.subr.bf16.mxu1 %v3619_v24 }
 0x173   : > { %1402 = vmatpush1.bf16.msra.mxu1 %v3617_v25 }
 0x174   : > { %1403 = vmatprep.subr.bf16.mxu1 %v3622_v27 }
 0x177   : > { %1404 = vmatpush1.bf16.msra.mxu1 %v3620_v28 }
 0x178   : > { %1419 = vmatprep.subr.bf16.mxu1 %v3625_v29 }
 0x17b   : > { %1420 = vmatpush2.bf16.msra.mxu1 %v3623_v32 }
 0x17c   : > { %1839 = vmatprep.subr.bf16.mxu1 %v3628_v38 }
 0x17e   : > { %1422 = vmatmul.mubr.bf16.vlgmr.msra.gmra.mxu1 %v1287_v35 }
 0x17f   : > { %3207 = vmatprep.mubr.msk.bf16.mxu1 %vm1049_vm11, %v1289_v11  ;;  %1840 = vmatpush1.bf16.msra.mxu1 %v3626_v36  ;;  %v3674_v11 = vld [vmem:[#allocation9 + $0x90] ss:$8 sps:$4 sm:$0xff]  }
 0x180   : > { %1841 = vmatprep.subr.bf16.mxu1 %v3631_v39  ;;  %1701 = vmatpush1.bf16.msra.mxu0 %v3674_v11 }
 0x181   : > { %1716 = vmatprep.subr.bf16.mxu0 %v3680_v13 }
 0x183   : > { %1842 = vmatpush1.bf16.msra.mxu1 %v3629_v40 }
 0x184   : > { %1843 = vmatprep.subr.bf16.mxu1 %v3634_v41  ;;  %1717 = vmatpush2.bf16.msra.mxu0 %v3678_v15 }
 0x185   : > { %2019 = vmatprep.subr.bf16.mxu0 %v3686_v16 }
 0x186   : > { %1432 = vmatmul.mubr.bf16.gmra.mxu1 %v1286_v33 }
 0x187   : > { %1844 = vmatpush1.bf16.msra.mxu1 %v3632_v42 }
 0x188   : > { %1845 = vmatprep.subr.bf16.mxu1 %v3640_v47 }
 0x18b   : > { %1846 = vmatpush1.bf16.msra.mxu1 %v3638_v48 }
 0x18c   : > { %1847 = vmatprep.subr.bf16.mxu1 %v3646_v51 }
 0x18f   : > { %1848 = vmatpush1.bf16.msra.mxu1 %v3644_v52 }
 0x190   : > { %1849 = vmatprep.subr.bf16.mxu1 %v3652_v56 }
 0x193   : > { %1850 = vmatpush1.bf16.msra.mxu1 %v3650_v58 }
 0x194   : > { %1851 = vmatprep.subr.bf16.mxu1 %v3658_v61 }
 0x197   : > { %1852 = vmatpush1.bf16.msra.mxu1 %v3656_v62 }
 0x198   : > { %1853 = vmatprep.subr.bf16.mxu1 %v3664_v3 }
 0x19b   : > { %1854 = vmatpush1.bf16.msra.mxu1 %v3662_v4 }
 0x19c   : > { %1869 = vmatprep.subr.bf16.mxu1 %v3670_v8 }
 0x19f   : > { %1870 = vmatpush2.bf16.msra.mxu1 %v3668_v7 }
 0x20f   : > { %v1243_v18 = vpop.f32.mrf.mxu0 }
 0x211   : > { %v1245_v19 = vpop.f32.mrf.mxu0 }
 0x213   : > { %v1247_v20 = vpop.f32.mrf.mxu0 }
 0x215   : > { %v1249_v21 = vpop.f32.mrf.mxu0 }
 0x217   : > { %v1253_v22 = vpop.f32.mrf.mxu0 }
 0x219   : > { %v1255_v23 = vpop.f32.mrf.mxu0 }
 0x21a   : > { %v1090_v24 = vpop.f32.mrf.mxu1 }
 0x21b   : > { %v1257_v25 = vpop.f32.mrf.mxu0  ;;  %v1244_v36 = vadd.f32 %v1243_v18, %v1090_v24 }
 0x21c   : > { %v1092_v27 = vpop.f32.mrf.mxu1 }
 0x21d   : > { %v1258_v28 = vpop.f32.mrf.mxu0  ;;  %v1246_v39 = vadd.f32 %v1245_v19, %v1092_v27 }
 0x21e   : > { %v1094_v29 = vpop.f32.mrf.mxu1 }
 0x21f   : > { %v1248_v42 = vadd.f32 %v1247_v20, %v1094_v29 }
 0x220   : > { %v1096_v31 = vpop.f32.mrf.mxu1 }
 0x221   : > { %v1250_v45 = vadd.f32 %v1249_v21, %v1096_v31 }
 0x222   : > { %v1100_v32 = vpop.f32.mrf.mxu1 }
 0x223   : > { %v1254_v52 = vadd.f32 %v1253_v22, %v1100_v32 }
 0x224   : > { %v1102_v33 = vpop.f32.mrf.mxu1 }
 0x225   : > { %v1256_v54 = vadd.f32 %v1255_v23, %v1102_v33  ;;  %v1501_v23 = vld [vmem:[#allocation4 + $0x10] sm:$0x33] }
 0x226   : > { %v1104_v34 = vpop.f32.mrf.mxu1 }
 0x228   : > { %v1105_v35 = vpop.f32.mrf.mxu1 }
 0x23e   : > { %v1423_v38 = vpop.f32.mrf.mxu1 }
 0x23f   : > { %v1440_v40 = vadd.f32 %v1423_v38, %v1244_v36 }
 0x240   : > { %v1425_v41 = vpop.f32.mrf.mxu1 }
 0x241   : > { %v1441_v43 = vadd.f32 %v1425_v41, %v1246_v39  ;;  %v1446_v46 = vmax.f32 %v1440_v40, 0.0 }
 0x242   : > { %v1427_v44 = vpop.f32.mrf.mxu1 }
 0x243   : > { %v1447_v47 = vmax.f32 %v1441_v43, 0.0  ;;  %v1442_v48 = vadd.f32 %v1427_v44, %v1248_v42 }
 0x244   : > { %v1429_v49 = vpop.f32.mrf.mxu1 }
 0x245   : > { %v3372_v50 = vpack.c.bf16 %v1447_v47, %v1446_v46  ;;  %v1443_v51 = vadd.f32 %v1429_v49, %v1250_v45  ;;  %v1448_v56 = vmax.f32 %v1442_v48, 0.0 }
 0x246   : > { %v1433_v53 = vpop.f32.mrf.mxu1 }
 0x247   : > { %v1470_v55 = vshrl.u32 %v3372_v50, 16  ;;  %v1449_v57 = vmax.f32 %v1443_v51, 0.0  ;;  %v1444_v58 = vadd.f32 %v1433_v53, %v1254_v52  ;;  %v1473_v61 = vshll.u32 %v3372_v50, 16  ;;  %v3684_v51 = vld [vmem:[#allocation9 + $0x190] ss:$8 sps:$4 sm:$0xff]  }
 0x248   : > { %v1435_v59 = vpop.f32.mrf.mxu1 }
 0x249   : > { %v1472_v60 = vrot.slane %v1470_v55, 7  ;;  %v3373_v62 = vpack.c.bf16 %v1449_v57, %v1448_v56  ;;  %v1445_v1 = vadd.f32 %v1435_v59, %v1256_v54  ;;  %v1450_v6 = vmax.f32 %v1444_v58, 0.0  ;;  %v3689_v55 = vld [vmem:[#allocation9 + $0x184] ss:$8 sps:$4 sm:$0xff]   ;;  %v3687_v56 = vld [vmem:[#allocation9 + $0x180] ss:$8 sps:$4 sm:$0xff]  }
 0x24a   : > { %v1437_v3 = vpop.f32.mrf.mxu1  ;;  %v3692_v58 = vld [vmem:[#allocation9 + $0x174] ss:$8 sps:$4 sm:$0xff]  }
 0x24b   : > { %v1475_v4 = vor.u32 %v1473_v61, %v1472_v60  ;;  %v1478_v5 = vshrl.u32 %v3373_v62, 16  ;;  %v1451_v7 = vmax.f32 %v1445_v1, 0.0  ;;  %v1481_v11 = vshll.u32 %v3373_v62, 16  ;;  %v3690_v62 = vld [vmem:[#allocation9 + $0x170] ss:$8 sps:$4 sm:$0xff]  }
 0x24c   : > { %v1438_v8 = vpop.f32.mrf.mxu1  ;;  %v1476_v13 = vrot.slane %v1472_v60, 4  ;;  %v3697_v3 = vld [vmem:[#allocation9 + $0x164] ss:$8 sps:$4 sm:$0xff]  }
 0x24d   : > { %v1498_v9 = vsel %vm4263_vm0, %v1475_v4, %v1497_v2  ;;  %v1480_v10 = vrot.slane %v1478_v5, 7  ;;  %v3374_v12 = vpack.c.bf16 %v1451_v7, %v1450_v6  ;;  %v3695_v5 = vld [vmem:[#allocation9 + $0x160] ss:$8 sps:$4 sm:$0xff]   ;;  %v3700_v6 = vld [vmem:[#allocation9 + $0x154] ss:$8 sps:$4 sm:$0xff]  }
 0x24e   : > { %1499 = vst [vmem:[#allocation4] sm:$0xff] %v1498_v9  ;;  %v3698_v7 = vld [vmem:[#allocation9 + $0x150] ss:$8 sps:$4 sm:$0xff]   ;;  %v3703_v8 = vld [vmem:[#allocation9 + $0x144] ss:$8 sps:$4 sm:$0xff]  }
 0x24f   : > { %v1483_v15 = vor.u32 %v1481_v11, %v1480_v10  ;;  %v1487_v16 = vshrl.u32 %v3374_v12, 16  ;;  %v1490_v20 = vshll.u32 %v3374_v12, 16  ;;  %v1485_v21 = vrot.slane %v1480_v10, 4  ;;  %v3706_v10 = vld [vmem:[#allocation9 + $0x134] ss:$8 sps:$4 sm:$0xff]  }
 0x250   : > { %v3704_v11 = vld [vmem:[#allocation9 + $0x130] ss:$8 sps:$4 sm:$0xff]   ;;  %v3709_v12 = vld [vmem:[#allocation9 + $0x124] ss:$8 sps:$4 sm:$0xff]  }
 0x251   : > { %v1484_v18 = vsel %vm4270_vm4, %v1476_v13, %v1483_v15  ;;  %v1489_v19 = vrot.slane %v1487_v16, 7  ;;  %v3707_v13 = vld [vmem:[#allocation9 + $0x120] ss:$8 sps:$4 sm:$0xff]   ;;  %v3712_v15 = vld [vmem:[#allocation9 + $0x1a4] ss:$8 sps:$4 sm:$0xff]  }
 0x252   : > { %1500 = vst.msk [vmem:[#allocation4 + $0x8] sm:$0xff] %vm4276_vm13, %v1484_v18  ;;  %v3710_v18 = vld [vmem:[#allocation9 + $0x1a0] ss:$8 sps:$4 sm:$0xff]  }
 0x253   : > { %v1492_v22 = vor.u32 %v1490_v20, %v1489_v19 }
 0x255   : > { %v1493_v24 = vsel %vm4270_vm4, %v1485_v21, %v1492_v22  ;;  %v1890_v57 = vld [vmem:[#allocation4] sm:$0xee]  ;;  %v3713_v22 = vld [vmem:[#allocation11 + $0x70] ss:$8 sps:$4 sm:$0xff]  }
 0x256   : > { %v1502_v25 = vsel %vm4285_vm1, %v1493_v24, %v1501_v23  ;;  %v3715_v23 = vld [vmem:[#allocation11 + $0x74] ss:$8 sps:$4 sm:$0xff]   ;;  %v3718_v24 = vld [vmem:[#allocation11 + $0x64] ss:$8 sps:$4 sm:$0xff]  }
 0x257   : > { %1503 = vst [vmem:[#allocation4 + $0x10] sm:$0x33] %v1502_v25  ;;  %v3716_v25 = vld [vmem:[#allocation11 + $0x60] ss:$8 sps:$4 sm:$0xff]  }
 0x259   : > { %v4384_v27 = vld [vmem:[#allocation4 + $0x8] sm:$0xff] }
 0x25a   : > { %v3211_v28 = vcombine.low %v1498_v9, %v4384_v27  ;;  %v3212_v29 = vcombine.high %v1498_v9, %v4384_v27  ;;  %v3258_v59 = vcombine.high %v1890_v57, %v4384_v27  ;;  %v3701_v9 = vld [vmem:[#allocation9 + $0x140] ss:$8 sps:$4 sm:$0xff]   ;;  %v3257_v16 = vcombine.low %v1890_v57, %v4384_v27  ;;  %v3721_v27 = vld [vmem:[#allocation11 + $0x54] ss:$8 sps:$4 sm:$0xff]   ;;  %v3758_v57 = vld [vmem:[#allocation11 + $0xa0] ss:$8 sps:$4 sm:$0xff]  }
 0x25c   : > { %3255 = vmatprep.mubr.msk.bf16.mxu1 %vm1049_vm11, %v3212_v29  ;;  %v1573_v31 = vshll.u32 %v3212_v29, 16  ;;  %v1561_v32 = vshll.u32 %v3211_v28, 16  ;;  %v1571_v41 = vshrl.u32 %v3212_v29, 16  ;;  %v1559_v43 = vshrl.u32 %v3211_v28, 16  ;;  %v3724_v29 = vld [vmem:[#allocation11 + $0x104] ss:$8 sps:$4 sm:$0xff]  }
 0x25d   : > { %1872 = vmatmul.mubr.bf16.vlgmr.msra.gmra.mxu1 %v3211_v28  ;;  %v1918_v2 = vrot.slane %v3258_v59, 1  ;;  %v1915_v20 = vrot.slane %v3257_v16, 1  ;;  %v3719_v28 = vld [vmem:[#allocation11 + $0x50] ss:$8 sps:$4 sm:$0xff]   ;;  %2316 = vmatprep.subr.bf16.mxu1 %v3724_v29 }
 0x25e   : > { %v1506_v33 = vld [vmem:[#allocation4 + $0x10] sm:$0x11]  ;;  %v1575_v35 = vrot.slane %v1573_v31, 1  ;;  %v1563_v40 = vrot.slane %v1561_v32, 1  ;;  %v405_v31 = vld [vmem:[#allocation5] sm:$0x11] }
 0x25f   : > { %v1525_v34 = vld [vmem:[#allocation4 + $0x10] sm:$0x33]  ;;  %v3236_v36 = vcombine.high %v1506_v33, %v1506_v33  ;;  %v3235_v45 = vcombine.low %v1506_v33, %v1506_v33  ;;  %v3722_v32 = vld [vmem:[#allocation11 + $0x100] ss:$8 sps:$4 sm:$0xff]   ;;  %v406_v33 = vsel %vm4165_vm14, 0, %v405_v31  ;;  %vm2852_vm14 = vcmask 877568  }
 0x260   : > { %v4389_v38 = vcombine.low %v1525_v34, %v1525_v34  ;;  %v4391_v39 = vcombine.high %v1525_v34, %v1525_v34  ;;  %v1576_v46 = vor.u32 %v1575_v35, %v1571_v41  ;;  %v1564_v48 = vor.u32 %v1563_v40, %v1559_v43  ;;  %407 = vst [vmem:[#allocation5] sm:$0x11] %v406_v33  ;;  %v3727_v34 = vld [vmem:[#allocation11 + $0x44] ss:$8 sps:$4 sm:$0xff]   ;;  %v3725_v35 = vld [vmem:[#allocation11 + $0x40] ss:$8 sps:$4 sm:$0xff]  }
 0x261   : > { %3256 = vmatprep.mubr.msk.bf16.mxu1 %vm1049_vm11, %v3236_v36  ;;  %2317 = vmatpush1.bf16.msra.mxu1 %v3722_v32  ;;  %v3730_v36 = vld [vmem:[#allocation11 + $0xf4] ss:$8 sps:$4 sm:$0xff]   ;;  %v3731_v40 = vld [vmem:[#allocation11 + $0x30] ss:$8 sps:$4 sm:$0xff]   ;;  %v3736_v41 = vld [vmem:[#allocation11 + $0xe4] ss:$8 sps:$4 sm:$0xff]  }
 0x262   : > { %v1578_v42 = vshll.u32 %v4391_v39, 16  ;;  %v1566_v44 = vshll.u32 %v4389_v38, 16  ;;  %v1585_v50 = vshrl.u32 %v4391_v39, 16  ;;  %v1582_v60 = vshrl.u32 %v4389_v38, 16  ;;  %2318 = vmatprep.subr.bf16.mxu1 %v3730_v36  ;;  %v3739_v43 = vld [vmem:[#allocation11 + $0x24] ss:$8 sps:$4 sm:$0xff]  }
 0x263   : > { %v1919_v61 = vrot.slane %v4391_v39, 1  ;;  %v1916_v19 = vrot.slane %v4389_v38, 1  ;;  %v3728_v38 = vld [vmem:[#allocation11 + $0xf0] ss:$8 sps:$4 sm:$0xff]   ;;  %v3733_v39 = vld [vmem:[#allocation11 + $0x34] ss:$8 sps:$4 sm:$0xff]  }
 0x264   : > { %v1580_v47 = vrot.slane %v1578_v42, 1  ;;  %v1568_v49 = vrot.slane %v1566_v44, 1  ;;  %v3734_v42 = vld [vmem:[#allocation11 + $0xe0] ss:$8 sps:$4 sm:$0xff]   ;;  %v409_v44 = vsel %vm4213_vm5, 0, %v408_v63  ;;  %vm2952_vm5 = vcmask 40960  }
 0x265   : > { %1882 = vmatmul.mubr.bf16.gmra.mxu1 %v3235_v45  ;;  %v1920_v4 = vsel %vm689_vm8, %v1918_v2, %v1919_v61  ;;  %v1917_v21 = vsel %vm689_vm8, %v1915_v20, %v1916_v19  ;;  %v3737_v45 = vld [vmem:[#allocation11 + $0x20] ss:$8 sps:$4 sm:$0xff]   ;;  %410 = vst [vmem:[#allocation5 + $0x10] sm:$0x22] %v409_v44  ;;  %v3761_v59 = vld [vmem:[#allocation11 + $0x90] ss:$8 sps:$4 sm:$0xff]  }
 0x266   : > { %v1581_v52 = vsel %vm463_vm7, %v1576_v46, %v1580_v47  ;;  %v1569_v53 = vsel %vm463_vm7, %v1564_v48, %v1568_v49  ;;  %v1587_v54 = vor.u32 %v1585_v50, %v1580_v47  ;;  %v1584_v1 = vor.u32 %v1582_v60, %v1568_v49  ;;  %2319 = vmatpush1.bf16.msra.mxu1 %v3728_v38  ;;  %v3742_v46 = vld [vmem:[#allocation11 + $0xd4] ss:$8 sps:$4 sm:$0xff]   ;;  %v3740_v47 = vld [vmem:[#allocation11 + $0xd0] ss:$8 sps:$4 sm:$0xff]   ;;  %v3748_v50 = vld [vmem:[#allocation11 + $0xc4] ss:$8 sps:$4 sm:$0xff]  }
 0x267   : > { %3233 = vmatprep.mubr.msk.bf16.mxu0 %vm1049_vm11, %v1581_v52  ;;  %2320 = vmatprep.subr.bf16.mxu1 %v3736_v41  ;;  %v3745_v48 = vld [vmem:[#allocation11 + $0x14] ss:$8 sps:$4 sm:$0xff]   ;;  %v3743_v49 = vld [vmem:[#allocation11 + $0x10] ss:$8 sps:$4 sm:$0xff]   ;;  %v3751_v52 = vld [vmem:[#allocation11 + $0x4] ss:$8 sps:$4 sm:$0xff]  }
 0x268   : > { %1719 = vmatmul.mubr.bf16.vlgmr.msra.gmra.mxu0 %v1569_v53  ;;  %v3749_v53 = vld [vmem:[#allocation11] ss:$8 sps:$4 sm:$0xff]   ;;  %v3763_v60 = vld [vmem:[#allocation11 + $0x94] ss:$8 sps:$4 sm:$0xff]  }
 0x269   : > { %2020 = vmatpush1.bf16.msra.mxu0 %v3684_v51  ;;  %3234 = vmatprep.mubr.msk.bf16.mxu0 %vm1049_vm11, %v1587_v54  ;;  %v3746_v51 = vld [vmem:[#allocation11 + $0xc0] ss:$8 sps:$4 sm:$0xff]   ;;  %v3752_v54 = vld [vmem:[#allocation11 + $0xb0] ss:$8 sps:$4 sm:$0xff]  }
 0x26a   : > { %2021 = vmatprep.subr.bf16.mxu0 %v3689_v55  ;;  %2321 = vmatpush1.bf16.msra.mxu1 %v3734_v42  ;;  %v3755_v55 = vld [vmem:[#allocation11 + $0x80] ss:$8 sps:$4 sm:$0xff]  }
 0x26b   : > { %2322 = vmatprep.subr.bf16.mxu1 %v3742_v46 }
 0x26d   : > { %2022 = vmatpush1.bf16.msra.mxu0 %v3687_v56  ;;  %v3757_v56 = vld [vmem:[#allocation11 + $0x84] ss:$8 sps:$4 sm:$0xff]  }
 0x26e   : > { %2023 = vmatprep.subr.bf16.mxu0 %v3692_v58  ;;  %2323 = vmatpush1.bf16.msra.mxu1 %v3740_v47  ;;  %v3760_v58 = vld [vmem:[#allocation11 + $0xa4] ss:$8 sps:$4 sm:$0xff]  }
 0x26f   : > { %2324 = vmatprep.subr.bf16.mxu1 %v3748_v50 }
 0x270   : > { %1729 = vmatmul.mubr.bf16.gmra.mxu0 %v1584_v1  ;;  %v3773_v1 = vld [vmem:[#allocation11 + $0x194] ss:$8 sps:$4 sm:$0xff]  }
 0x271   : > { %2024 = vmatpush1.bf16.msra.mxu0 %v3690_v62  ;;  %3277 = vmatprep.mubr.msk.bf16.mxu0 %vm1049_vm11, %v1920_v4  ;;  %v3765_v62 = vld [vmem:[#allocation11 + $0x110] ss:$8 sps:$4 sm:$0xff]  }
 0x272   : > { %2025 = vmatprep.subr.bf16.mxu0 %v3697_v3  ;;  %2325 = vmatpush1.bf16.msra.mxu1 %v3746_v51 }
 0x273   : > { %2326 = vmatprep.subr.bf16.mxu1 %v3754_v17 }
 0x275   : > { %2026 = vmatpush1.bf16.msra.mxu0 %v3695_v5 }
 0x276   : > { %2027 = vmatprep.subr.bf16.mxu0 %v3700_v6  ;;  %2327 = vmatpush1.bf16.msra.mxu1 %v3752_v54 }
 0x277   : > { %2328 = vmatprep.subr.bf16.mxu1 %v3760_v58 }
 0x279   : > { %2028 = vmatpush1.bf16.msra.mxu0 %v3698_v7 }
 0x27a   : > { %2029 = vmatprep.subr.bf16.mxu0 %v3703_v8  ;;  %2329 = vmatpush1.bf16.msra.mxu1 %v3758_v57 }
 0x27b   : > { %2330 = vmatprep.subr.bf16.mxu1 %v3763_v60 }
 0x27d   : > { %2030 = vmatpush1.bf16.msra.mxu0 %v3701_v9 }
 0x27e   : > { %2031 = vmatprep.subr.bf16.mxu0 %v3706_v10  ;;  %2331 = vmatpush1.bf16.msra.mxu1 %v3761_v59 }
 0x281   : > { %2032 = vmatpush1.bf16.msra.mxu0 %v3704_v11 }
 0x282   : > { %2033 = vmatprep.subr.bf16.mxu0 %v3709_v12 }
 0x285   : > { %2034 = vmatpush1.bf16.msra.mxu0 %v3707_v13 }
 0x286   : > { %2049 = vmatprep.subr.bf16.mxu0 %v3712_v15 }
 0x289   : > { %2050 = vmatpush2.bf16.msra.mxu0 %v3710_v18 }
 0x28a   : > { %2469 = vmatprep.subr.bf16.mxu0 %v3715_v23 }
 0x28c   : > { %2052 = vmatmul.mubr.bf16.vlgmr.msra.gmra.mxu0 %v1917_v21 }
 0x28d   : > { %3278 = vmatprep.mubr.msk.bf16.mxu0 %vm1049_vm11, %v1919_v61  ;;  %2470 = vmatpush1.bf16.msra.mxu0 %v3713_v22  ;;  %v3767_v61 = vld [vmem:[#allocation11 + $0x114] ss:$8 sps:$4 sm:$0xff]  }
 0x28e   : > { %2471 = vmatprep.subr.bf16.mxu0 %v3718_v24  ;;  %2346 = vmatprep.subr.bf16.mxu1 %v3767_v61 }
 0x28f   : > { %2347 = vmatpush2.bf16.msra.mxu1 %v3765_v62 }
 0x290   : > { %2649 = vmatprep.subr.bf16.mxu1 %v3773_v1 }
 0x291   : > { %2472 = vmatpush1.bf16.msra.mxu0 %v3716_v25 }
 0x292   : > { %2473 = vmatprep.subr.bf16.mxu0 %v3721_v27 }
 0x294   : > { %2062 = vmatmul.mubr.bf16.gmra.mxu0 %v1916_v19 }
 0x295   : > { %2474 = vmatpush1.bf16.msra.mxu0 %v3719_v28 }
 0x296   : > { %2475 = vmatprep.subr.bf16.mxu0 %v3727_v34 }
 0x299   : > { %2476 = vmatpush1.bf16.msra.mxu0 %v3725_v35 }
 0x29a   : > { %2477 = vmatprep.subr.bf16.mxu0 %v3733_v39 }
 0x29d   : > { %2478 = vmatpush1.bf16.msra.mxu0 %v3731_v40 }
 0x29e   : > { %2479 = vmatprep.subr.bf16.mxu0 %v3739_v43 }
 0x2a1   : > { %2480 = vmatpush1.bf16.msra.mxu0 %v3737_v45 }
 0x2a2   : > { %2481 = vmatprep.subr.bf16.mxu0 %v3745_v48 }
 0x2a5   : > { %2482 = vmatpush1.bf16.msra.mxu0 %v3743_v49  ;;  %v2127_v49 = vld [vmem:[#allocation5] sm:$0xff] }
 0x2a6   : > { %2483 = vmatprep.subr.bf16.mxu0 %v3751_v52 }
 0x2a9   : > { %2484 = vmatpush1.bf16.msra.mxu0 %v3749_v53 }
 0x2aa   : > { %2499 = vmatprep.subr.bf16.mxu0 %v3757_v56 }
 0x2ad   : > { %2500 = vmatpush2.bf16.msra.mxu0 %v3755_v55 }
 0x2ae   : > { %2794 = vmatprep.subr.bf16.mxu0 %v3962_v0 }
 0x31d   : > { %v1873_v2 = vpop.f32.mrf.mxu1 }
 0x31f   : > { %v1875_v3 = vpop.f32.mrf.mxu1 }
 0x321   : > { %v1877_v4 = vpop.f32.mrf.mxu1 }
 0x323   : > { %v1879_v5 = vpop.f32.mrf.mxu1 }
 0x325   : > { %v1883_v6 = vpop.f32.mrf.mxu1 }
 0x327   : > { %v1885_v7 = vpop.f32.mrf.mxu1 }
 0x328   : > { %v1720_v8 = vpop.f32.mrf.mxu0 }
 0x329   : > { %v1887_v9 = vpop.f32.mrf.mxu1  ;;  %v1874_v20 = vadd.f32 %v1873_v2, %v1720_v8 }
 0x32a   : > { %v1722_v10 = vpop.f32.mrf.mxu0 }
 0x32b   : > { %v1888_v11 = vpop.f32.mrf.mxu1  ;;  %v1876_v22 = vadd.f32 %v1875_v3, %v1722_v10 }
 0x32c   : > { %v1724_v12 = vpop.f32.mrf.mxu0 }
 0x32d   : > { %v1878_v25 = vadd.f32 %v1877_v4, %v1724_v12 }
 0x32e   : > { %v1726_v13 = vpop.f32.mrf.mxu0 }
 0x32f   : > { %v1880_v29 = vadd.f32 %v1879_v5, %v1726_v13  ;;  %v2131_v5 = vld [vmem:[#allocation5 + $0x10] sm:$0x33] }
 0x330   : > { %v1730_v15 = vpop.f32.mrf.mxu0 }
 0x331   : > { %v1884_v38 = vadd.f32 %v1883_v6, %v1730_v15 }
 0x332   : > { %v1732_v16 = vpop.f32.mrf.mxu0 }
 0x333   : > { %v1886_v40 = vadd.f32 %v1885_v7, %v1732_v16 }
 0x334   : > { %v1734_v18 = vpop.f32.mrf.mxu0 }
 0x336   : > { %v1735_v19 = vpop.f32.mrf.mxu0 }
 0x34c   : > { %v2053_v21 = vpop.f32.mrf.mxu0 }
 0x34d   : > { %v2070_v23 = vadd.f32 %v2053_v21, %v1874_v20 }
 0x34e   : > { %v2055_v24 = vpop.f32.mrf.mxu0 }
 0x34f   : > { %v2071_v27 = vadd.f32 %v2055_v24, %v1876_v22  ;;  %v2076_v31 = vmax.f32 %v2070_v23, 0.0 }
 0x350   : > { %v2057_v28 = vpop.f32.mrf.mxu0 }
 0x351   : > { %v2077_v32 = vmax.f32 %v2071_v27, 0.0  ;;  %v2072_v33 = vadd.f32 %v2057_v28, %v1878_v25 }
 0x352   : > { %v2059_v34 = vpop.f32.mrf.mxu0 }
 0x353   : > { %v3375_v35 = vpack.c.bf16 %v2077_v32, %v2076_v31  ;;  %v2073_v36 = vadd.f32 %v2059_v34, %v1880_v29  ;;  %v2078_v42 = vmax.f32 %v2072_v33, 0.0  ;;  %v3771_v29 = vld [vmem:[#allocation11 + $0x190] ss:$8 sps:$4 sm:$0xff]   ;;  %v3776_v34 = vld [vmem:[#allocation11 + $0x184] ss:$8 sps:$4 sm:$0xff]  }
 0x354   : > { %v2063_v39 = vpop.f32.mrf.mxu0 }
 0x355   : > { %v2100_v41 = vshrl.u32 %v3375_v35, 16  ;;  %v2079_v63 = vmax.f32 %v2073_v36, 0.0  ;;  %v2074_v43 = vadd.f32 %v2063_v39, %v1884_v38  ;;  %v2103_v46 = vshll.u32 %v3375_v35, 16  ;;  %v3774_v35 = vld [vmem:[#allocation11 + $0x180] ss:$8 sps:$4 sm:$0xff]  }
 0x356   : > { %v2065_v44 = vpop.f32.mrf.mxu0  ;;  %v3779_v38 = vld [vmem:[#allocation11 + $0x174] ss:$8 sps:$4 sm:$0xff]  }
 0x357   : > { %v2102_v45 = vrot.slane %v2100_v41, 7  ;;  %v3376_v47 = vpack.c.bf16 %v2079_v63, %v2078_v42  ;;  %v2075_v48 = vadd.f32 %v2065_v44, %v1886_v40  ;;  %v2080_v53 = vmax.f32 %v2074_v43, 0.0  ;;  %v3777_v42 = vld [vmem:[#allocation11 + $0x170] ss:$8 sps:$4 sm:$0xff]   ;;  %v3784_v44 = vld [vmem:[#allocation11 + $0x164] ss:$8 sps:$4 sm:$0xff]  }
 0x358   : > { %v2067_v50 = vpop.f32.mrf.mxu0 }
 0x359   : > { %v2105_v51 = vor.u32 %v2103_v46, %v2102_v45  ;;  %v2108_v52 = vshrl.u32 %v3376_v47, 16  ;;  %v2081_v17 = vmax.f32 %v2075_v48, 0.0  ;;  %v2111_v57 = vshll.u32 %v3376_v47, 16  ;;  %v3782_v46 = vld [vmem:[#allocation11 + $0x160] ss:$8 sps:$4 sm:$0xff]  }
 0x35a   : > { %v2068_v54 = vpop.f32.mrf.mxu0  ;;  %v2106_v59 = vrot.slane %v2102_v45, 4  ;;  %v3787_v47 = vld [vmem:[#allocation11 + $0x154] ss:$8 sps:$4 sm:$0xff]   ;;  %v3785_v48 = vld [vmem:[#allocation11 + $0x150] ss:$8 sps:$4 sm:$0xff]  }
 0x35b   : > { %v2128_v55 = vsel %vm4263_vm0, %v2105_v51, %v2127_v49  ;;  %v2110_v56 = vrot.slane %v2108_v52, 7  ;;  %v3377_v58 = vpack.c.bf16 %v2081_v17, %v2080_v53  ;;  %v3790_v49 = vld [vmem:[#allocation11 + $0x144] ss:$8 sps:$4 sm:$0xff]   ;;  %v3788_v50 = vld [vmem:[#allocation11 + $0x140] ss:$8 sps:$4 sm:$0xff]  }
 0x35c   : > { %2129 = vst [vmem:[#allocation5] sm:$0xff] %v2128_v55  ;;  %v3793_v51 = vld [vmem:[#allocation11 + $0x134] ss:$8 sps:$4 sm:$0xff]   ;;  %v3791_v52 = vld [vmem:[#allocation11 + $0x130] ss:$8 sps:$4 sm:$0xff]  }
 0x35d   : > { %v2113_v60 = vor.u32 %v2111_v57, %v2110_v56  ;;  %v2117_v61 = vshrl.u32 %v3377_v58, 16  ;;  %v2120_v2 = vshll.u32 %v3377_v58, 16  ;;  %v2115_v3 = vrot.slane %v2110_v56, 4  ;;  %v3796_v53 = vld [vmem:[#allocation11 + $0x124] ss:$8 sps:$4 sm:$0xff]  }
 0x35e   : > { %v3794_v17 = vld [vmem:[#allocation11 + $0x120] ss:$8 sps:$4 sm:$0xff]   ;;  %v3799_v54 = vld [vmem:[#allocation11 + $0x1a4] ss:$8 sps:$4 sm:$0xff]  }
 0x35f   : > { %v2114_v62 = vsel %vm4270_vm4, %v2106_v59, %v2113_v60  ;;  %v2119_v1 = vrot.slane %v2117_v61, 7  ;;  %v3797_v56 = vld [vmem:[#allocation11 + $0x1a0] ss:$8 sps:$4 sm:$0xff]   ;;  %v3800_v60 = vld [vmem:[%s4606_s5 + $0x38] sm:$0xff]   ;;  %v3801_v61 = vld [vmem:[%s4606_s5 + $0x30] sm:$0xff]  }
 0x360   : > { %2130 = vst.msk [vmem:[#allocation5 + $0x8] sm:$0xff] %vm4276_vm13, %v2114_v62  ;;  %v3802_v62 = vld [vmem:[%s4606_s5 + $0x28] sm:$0xff]  }
 0x361   : > { %v2122_v4 = vor.u32 %v2120_v2, %v2119_v1  ;;  %v3803_v1 = vld [vmem:[%s4606_s5 + $0x20] sm:$0xff]   ;;  %v3804_v2 = vld [vmem:[%s4606_s5 + $0x18] sm:$0xff]  }
 0x363   : > { %v2123_v14 = vsel %vm4270_vm4, %v2115_v3, %v2122_v4  ;;  %v2520_v36 = vld [vmem:[#allocation5] sm:$0xee]  ;;  %v3805_v3 = vld [vmem:[%s4606_s5 + $0x10] sm:$0xff]   ;;  %v3806_v4 = vld [vmem:[%s4606_s5 + $0x8] sm:$0xff]  }
 0x364   : > { %v2132_v6 = vsel %vm4285_vm1, %v2123_v14, %v2131_v5  ;;  %v3807_v5 = vld [vmem:[%s4606_s5] sm:$0xff]  }
 0x365   : > { %2133 = vst [vmem:[#allocation5 + $0x10] sm:$0x33] %v2132_v6  ;;  %v3808_v14 = vld [vmem:[%s4606_s5 + $0x40] sm:$0xff]   ;;  %v2874_v6 = vld [vmem:[%s4608_s7 + $0x68] sm:$0xf] }
 0x367   : > { %v4425_v7 = vld [vmem:[#allocation5 + $0x8] sm:$0xff] }
 0x368   : > { %v3282_v8 = vcombine.low %v2128_v55, %v4425_v7  ;;  %v3283_v9 = vcombine.high %v2128_v55, %v4425_v7  ;;  %v3329_v39 = vcombine.high %v2520_v36, %v4425_v7  ;;  %v3328_v55 = vcombine.low %v2520_v36, %v4425_v7 }
 0x369   : > { %v3963_v7 = vmov 0.0  }
 0x36a   : > { %3326 = vmatprep.mubr.msk.bf16.mxu0 %vm1049_vm11, %v3283_v9  ;;  %v2203_v30 = vshll.u32 %v3283_v9, 16  ;;  %v2191_v10 = vshll.u32 %v3282_v8, 16  ;;  %v2201_v18 = vshrl.u32 %v3283_v9, 16  ;;  %v2189_v20 = vshrl.u32 %v3282_v8, 16 }
 0x36b   : > { %2502 = vmatmul.mubr.bf16.vlgmr.msra.gmra.mxu0 %v3282_v8  ;;  %v2548_v43 = vrot.slane %v3329_v39, 1  ;;  %v2545_v58 = vrot.slane %v3328_v55, 1  ;;  %v2871_v55 = vld [vmem:[%s4608_s7 + $0x50] sm:$0xff] }
 0x36c   : > { %v2136_v11 = vld [vmem:[#allocation5 + $0x10] sm:$0x11]  ;;  %v2205_v13 = vrot.slane %v2203_v30, 1  ;;  %v2193_v16 = vrot.slane %v2191_v10, 1  ;;  %2795 = vmatpush1.bf16.msra.mxu0 %v3800_v60 }
 0x36d   : > { %v2155_v12 = vld [vmem:[#allocation5 + $0x10] sm:$0x33]  ;;  %v3307_v26 = vcombine.high %v2136_v11, %v2136_v11  ;;  %v3306_v22 = vcombine.low %v2136_v11, %v2136_v11  ;;  %2796 = vmatprep.subr.bf16.mxu0 %v3962_v0 }
 0x36e   : > { %v4430_v15 = vcombine.low %v2155_v12, %v2155_v12  ;;  %v4432_v37 = vcombine.high %v2155_v12, %v2155_v12  ;;  %v2206_v23 = vor.u32 %v2205_v13, %v2201_v18  ;;  %v2194_v25 = vor.u32 %v2193_v16, %v2189_v20  ;;  %v2866_v60 = vld [vmem:[%s4608_s7 + $0x28] sm:$0xff] }
 0x36f   : > { %3327 = vmatprep.mubr.msk.bf16.mxu0 %vm1049_vm11, %v3307_v26 }
 0x370   : > { %v2208_v19 = vshll.u32 %v4432_v37, 16  ;;  %v2196_v21 = vshll.u32 %v4430_v15, 16  ;;  %v2215_v28 = vshrl.u32 %v4432_v37, 16  ;;  %v2212_v40 = vshrl.u32 %v4430_v15, 16  ;;  %2797 = vmatpush1.bf16.msra.mxu0 %v3801_v61  ;;  %v2865_v61 = vld [vmem:[%s4608_s7 + $0x20] sm:$0xff] }
 0x371   : > { %v2549_v41 = vrot.slane %v4432_v37, 1  ;;  %v2546_v57 = vrot.slane %v4430_v15, 1  ;;  %2798 = vmatprep.subr.bf16.mxu0 %v3962_v0 }
 0x372   : > { %v2210_v24 = vrot.slane %v2208_v19, 1  ;;  %v2198_v27 = vrot.slane %v2196_v21, 1 }
 0x373   : > { %2512 = vmatmul.mubr.bf16.gmra.mxu0 %v3306_v22  ;;  %v2550_v45 = vsel %vm689_vm8, %v2548_v43, %v2549_v41  ;;  %v2547_v59 = vsel %vm689_vm8, %v2545_v58, %v2546_v57  ;;  %v2868_v58 = vld [vmem:[%s4608_s7 + $0x38] sm:$0xff]  ;;  %vm2848_vm8 = vcmask 883712  }
 0x374   : > { %v2211_v31 = vsel %vm463_vm7, %v2206_v23, %v2210_v24  ;;  %v2199_v32 = vsel %vm463_vm7, %v2194_v25, %v2198_v27  ;;  %v2217_v33 = vor.u32 %v2215_v28, %v2210_v24  ;;  %v2214_v63 = vor.u32 %v2212_v40, %v2198_v27  ;;  %2799 = vmatpush1.bf16.msra.mxu0 %v3802_v62  ;;  %v2864_v62 = vld [vmem:[%s4608_s7 + $0x18] sm:$0xff] }
 0x375   : > { %3304 = vmatprep.mubr.msk.bf16.mxu1 %vm1049_vm11, %v2211_v31  ;;  %2800 = vmatprep.subr.bf16.mxu0 %v3962_v0  ;;  %vm3964_vm7 = vmmov 0  }
 0x376   : > { %2349 = vmatmul.mubr.bf16.vlgmr.msra.gmra.mxu1 %v2199_v32 }
 0x377   : > { %2650 = vmatpush1.bf16.msra.mxu1 %v3771_v29  ;;  %3305 = vmatprep.mubr.msk.bf16.mxu1 %vm1049_vm11, %v2217_v33 }
 0x378   : > { %2651 = vmatprep.subr.bf16.mxu1 %v3776_v34  ;;  %2801 = vmatpush1.bf16.msra.mxu0 %v3803_v1  ;;  %v2863_v1 = vld [vmem:[%s4608_s7 + $0x10] sm:$0xff] }
 0x379   : > { %2802 = vmatprep.subr.bf16.mxu0 %v3962_v0 }
 0x37b   : > { %2652 = vmatpush1.bf16.msra.mxu1 %v3774_v35 }
 0x37c   : > { %2653 = vmatprep.subr.bf16.mxu1 %v3779_v38  ;;  %2803 = vmatpush1.bf16.msra.mxu0 %v3804_v2  ;;  %v2862_v2 = vld [vmem:[%s4608_s7 + $0x8] sm:$0xff] }
 0x37d   : > { %2804 = vmatprep.subr.bf16.mxu0 %v3962_v0 }
 0x37e   : > { %2359 = vmatmul.mubr.bf16.gmra.mxu1 %v2214_v63 }
 0x37f   : > { %2654 = vmatpush1.bf16.msra.mxu1 %v3777_v42  ;;  %3348 = vmatprep.mubr.msk.bf16.mxu1 %vm1049_vm11, %v2550_v45 }
 0x380   : > { %2655 = vmatprep.subr.bf16.mxu1 %v3784_v44  ;;  %2805 = vmatpush1.bf16.msra.mxu0 %v3805_v3  ;;  %v2861_v3 = vld [vmem:[%s4608_s7] sm:$0xff] }
 0x381   : > { %2806 = vmatprep.subr.bf16.mxu0 %v3962_v0 }
 0x383   : > { %2656 = vmatpush1.bf16.msra.mxu1 %v3782_v46 }
 0x384   : > { %2657 = vmatprep.subr.bf16.mxu1 %v3787_v47  ;;  %2807 = vmatpush1.bf16.msra.mxu0 %v3806_v4 }
 0x385   : > { %2808 = vmatprep.subr.bf16.mxu0 %v3962_v0 }
 0x387   : > { %2658 = vmatpush1.bf16.msra.mxu1 %v3785_v48 }
 0x388   : > { %2659 = vmatprep.subr.bf16.mxu1 %v3790_v49  ;;  %2809 = vmatpush1.bf16.msra.mxu0 %v3807_v5  ;;  %v2842_v5 = vld [vmem:[%s4607_s6] sm:$0xff] }
 0x389   : > { %2824 = vmatprep.subr.bf16.mxu0 %v3962_v0 }
 0x38b   : > { %2660 = vmatpush1.bf16.msra.mxu1 %v3788_v50 }
 0x38c   : > { %2661 = vmatprep.subr.bf16.mxu1 %v3793_v51  ;;  %2825 = vmatpush2.bf16.msra.mxu0 %v3808_v14 }
 0x38f   : > { %2662 = vmatpush1.bf16.msra.mxu1 %v3791_v52 }
 0x390   : > { %2663 = vmatprep.subr.bf16.mxu1 %v3796_v53 }
 0x393   : > { %2664 = vmatpush1.bf16.msra.mxu1 %v3794_v17  ;;  %v2873_v17 = vld [vmem:[%s4608_s7 + $0x60] sm:$0xff] }
 0x394   : > { %2679 = vmatprep.subr.bf16.mxu1 %v3799_v54  ;;  %v2872_v54 = vld [vmem:[%s4608_s7 + $0x58] sm:$0xff] }
 0x397   : > { %2680 = vmatpush2.bf16.msra.mxu1 %v3797_v56  ;;  %v2870_v56 = vld [vmem:[%s4608_s7 + $0x48] sm:$0xff] }
 0x398   : > { %3393 = vmatprep.subr.mxu1 %v3963_v7 }
 0x39a   : > { %2682 = vmatmul.mubr.bf16.vlgmr.msra.gmra.mxu1 %v2547_v59  ;;  %v2867_v59 = vld [vmem:[%s4608_s7 + $0x30] sm:$0xff] }
 0x39b   : > { %3349 = vmatprep.mubr.msk.bf16.mxu1 %vm1049_vm11, %v2549_v41  ;;  %3394 = vmatpush3.msk.msra.mxu1 %vm849_vm6, %v2874_v6  ;;  %v2843_v6 = vld [vmem:[%s4607_s6 + $0x8] sm:$0xff] }
 0x39c   : > { %3395 = vmatprep.subr.mxu1 %v3963_v7 }
 0x39d   : > { %3396 = vmatpush3.msra.mxu1 %v2873_v17 }
 0x39e   : > { %3397 = vmatprep.subr.mxu1 %v3963_v7 }
 0x39f   : > { %3398 = vmatpush3.msra.mxu1 %v2872_v54 }
 0x3a0   : > { %3399 = vmatprep.subr.mxu1 %v3963_v7 }
 0x3a1   : > { %3400 = vmatpush3.msra.mxu1 %v2871_v55 }
 0x3a2   : > { %2692 = vmatmul.mubr.bf16.gmra.mxu1 %v2546_v57  ;;  %3401 = vmatprep.subr.mxu1 %v3963_v7  ;;  %v2869_v57 = vld [vmem:[%s4608_s7 + $0x40] sm:$0xff] }
 0x3a3   : > { %3402 = vmatpush3.msra.mxu1 %v2870_v56  ;;  %3421 = vmatprep.mubr.msk.f32.mxu1 %vm3964_vm7, %v3963_v7 }
 0x3a4   : > { %3403 = vmatprep.subr.mxu1 %v3963_v7 }
 0x3a5   : > { %3404 = vmatpush3.msra.mxu1 %v2869_v57 }
 0x3a6   : > { %3405 = vmatprep.subr.mxu1 %v3963_v7 }
 0x3a7   : > { %3406 = vmatpush3.msra.mxu1 %v2868_v58 }
 0x3a8   : > { %3407 = vmatprep.subr.mxu1 %v3963_v7 }
 0x3a9   : > { %3408 = vmatpush3.msra.mxu1 %v2867_v59 }
 0x3aa   : > { %3409 = vmatprep.subr.mxu1 %v3963_v7 }
 0x3ab   : > { %3410 = vmatpush3.msra.mxu1 %v2866_v60 }
 0x3ac   : > { %3411 = vmatprep.subr.mxu1 %v3963_v7 }
 0x3ad   : > { %3412 = vmatpush3.msra.mxu1 %v2865_v61 }
 0x3ae   : > { %3413 = vmatprep.subr.mxu1 %v3963_v7 }
 0x3af   : > { %3414 = vmatpush3.msra.mxu1 %v2864_v62 }
 0x3b0   : > { %3415 = vmatprep.subr.mxu1 %v3963_v7 }
 0x3b1   : > { %3416 = vmatpush3.msra.mxu1 %v2863_v1 }
 0x3b2   : > { %3417 = vmatprep.subr.mxu1 %v3963_v7 }
 0x3b3   : > { %3418 = vmatpush3.msra.mxu1 %v2862_v2 }
 0x3b4   : > { %3419 = vmatprep.subr.mxu1 %v3963_v7 }
 0x3b5   : > { %3420 = vmatpush3.msra.mxu1 %v2861_v3 }
 0x42b   : > { %v2503_v8 = vpop.f32.mrf.mxu0 }
 0x42d   : > { %v2505_v9 = vpop.f32.mrf.mxu0 }
 0x42f   : > { %v2507_v30 = vpop.f32.mrf.mxu0 }
 0x431   : > { %v2509_v0 = vpop.f32.mrf.mxu0 }
 0x433   : > { %v2513_v10 = vpop.f32.mrf.mxu0 }
 0x435   : > { %v2515_v11 = vpop.f32.mrf.mxu0 }
 0x436   : > { %v2350_v12 = vpop.f32.mrf.mxu1 }
 0x437   : > { %v2517_v13 = vpop.f32.mrf.mxu0  ;;  %v2504_v27 = vadd.f32 %v2503_v8, %v2350_v12 }
 0x438   : > { %v2352_v26 = vpop.f32.mrf.mxu1 }
 0x439   : > { %v2518_v15 = vpop.f32.mrf.mxu0  ;;  %v2506_v24 = vadd.f32 %v2505_v9, %v2352_v26 }
 0x43a   : > { %v2354_v37 = vpop.f32.mrf.mxu1 }
 0x43b   : > { %v2508_v25 = vadd.f32 %v2507_v30, %v2354_v37 }
 0x43c   : > { %v2356_v16 = vpop.f32.mrf.mxu1 }
 0x43d   : > { %v2510_v29 = vadd.f32 %v2509_v0, %v2356_v16 }
 0x43e   : > { %v2360_v18 = vpop.f32.mrf.mxu1 }
 0x43f   : > { %v2514_v42 = vadd.f32 %v2513_v10, %v2360_v18  ;;  %v2844_v10 = vld [vmem:[%s4607_s6 + $0x10] sm:$0x3] }
 0x440   : > { %v2362_v19 = vpop.f32.mrf.mxu1 }
 0x441   : > { %v2516_v39 = vadd.f32 %v2515_v11, %v2362_v19 }
 0x442   : > { %v2364_v20 = vpop.f32.mrf.mxu1 }
 0x444   : > { %v2365_v21 = vpop.f32.mrf.mxu1 }
 0x45a   : > { %v2683_v22 = vpop.f32.mrf.mxu1 }
 0x45b   : > { %v2700_v33 = vadd.f32 %v2683_v22, %v2504_v27  ;;  %v2875_v27 = vld [vmem:[%s4609_s8] sm:$0x1] }
 0x45c   : > { %v2685_v23 = vpop.f32.mrf.mxu1 }
 0x45d   : > { %v2701_v31 = vadd.f32 %v2685_v23, %v2506_v24  ;;  %v2706_v63 = vmax.f32 %v2700_v33, 0.0 }
 0x45e   : > { %v2687_v28 = vpop.f32.mrf.mxu1 }
 0x45f   : > { %v2702_v32 = vadd.f32 %v2687_v28, %v2508_v25  ;;  %v2707_v40 = vmax.f32 %v2701_v31, 0.0 }
 0x460   : > { %v2689_v34 = vpop.f32.mrf.mxu1 }
 0x461   : > { %v2703_v35 = vadd.f32 %v2689_v34, %v2510_v29  ;;  %v2708_v36 = vmax.f32 %v2702_v32, 0.0 }
 0x462   : > { %v2693_v38 = vpop.f32.mrf.mxu1 }
 0x463   : > { %v2709_v41 = vmax.f32 %v2703_v35, 0.0  ;;  %v2712_v46 = vpack.c.bf16 %v2708_v36, %v2706_v63  ;;  %v2704_v47 = vadd.f32 %v2693_v38, %v2514_v42 }
 0x464   : > { %v2695_v43 = vpop.f32.mrf.mxu1 }
 0x465   : > { %v2713_v44 = vpack.c.bf16 %v2709_v41, %v2707_v40  ;;  %v2705_v45 = vadd.f32 %v2695_v43, %v2516_v39  ;;  %v2710_v52 = vmax.f32 %v2704_v47, 0.0 }
 0x466   : > { %v2697_v48 = vpop.f32.mrf.mxu1 }
 0x467   : > { %v2711_v49 = vmax.f32 %v2705_v45, 0.0  ;;  %3359 = vmatprep.mubr.msk.bf16.mxu0 %vm1049_vm11, %v2713_v44  ;;  %v2714_v53 = vpack.c.bf16 %v2710_v52, %v2710_v52 }
 0x468   : > { %v2698_v50 = vpop.f32.mrf.mxu1  ;;  %2827 = vmatmul.mubr.bf16.vlgmr.msra.gmra.mxu0 %v2712_v46 }
 0x469   : > { %v2715_v51 = vpack.c.bf16 %v2711_v49, %v2711_v49 }
 0x46b   : > { %3360 = vmatprep.mubr.msk.bf16.mxu0 %vm1049_vm11, %v2715_v51 }
 0x470   : > { %2835 = vmatmul.mubr.bf16.gmra.mxu0 %v2714_v53 }
 0x528   : > { %v2828_v4 = vpop.f32.mrf.mxu0 }
 0x529   : > { %v2845_v9 = vmul.f32 %v2842_v5, %v2828_v4 }
 0x52a   : > { %v2830_v14 = vpop.f32.mrf.mxu0 }
 0x52b   : > { %v2849_v12 = vsel %vm2848_vm8, %v2845_v9, 0.0 }
 0x52c   : > { %v2831_v8 = vpop.f32.mrf.mxu0 }
 0x52d   : > { %v2846_v30 = vmul.f32 %v2843_v6, %v2831_v8 }
 0x52e   : > { %v2833_v0 = vpop.f32.mrf.mxu0 }
 0x52f   : > { %v2850_v7 = vsel %vm2848_vm8, %v2846_v30, 0.0 }
 0x530   : > { %v2836_v11 = vpop.f32.mrf.mxu0  ;;  %v2851_v26 = vadd.f32 %v2850_v7, %v2849_v12 }
 0x531   : > { %v2847_v13 = vmul.f32 %v2844_v10, %v2836_v11 }
 0x532   : > { %v2838_v15 = vpop.f32.mrf.mxu0 }
 0x533   : > { %v2853_v37 = vsel %vm2852_vm14, %v2847_v13, 0.0 }
 0x534   : > { %v2854_v16 = vadd.f32 %v2853_v37, %v2851_v26  ;;  %v2839_v18 = vpop.f32.mrf.mxu0 }
 0x536   : > { %v2855_v19 = vrot.slane %v2854_v16, 4  ;;  %v2840_v20 = vpop.f32.mrf.mxu0 }
 0x538   : > { %v2856_v21 = vadd.f32 %v2855_v19, %v2854_v16 }
 0x53a   : > { %v2857_v22 = vrot.slane %v2856_v21, 2 }
 0x53c   : > { %v2858_v23 = vadd.f32 %v2857_v22, %v2856_v21 }
 0x53e   : > { %v2859_v24 = vrot.slane %v2858_v23, 1 }
 0x540   : > { %v2860_v25 = vadd.f32 %v2859_v24, %v2858_v23 }
 0x542   : > { %3422 = vmatmul.mubr.msk.f32.vlgmr.msra.gmra.mxu1 %vm2848_vm8, %v2860_v25 }
 0x602   : > { %v2948_v28 = vpop.f32.mrf.mxu1 }
 0x603   : > { %v2949_v29 = vadd.f32 %v2948_v28, %v2875_v27 }
 0x604   : > { %v3423_v31 = vpop.f32.mrf.mxu1 }
 0x605   : > { %2953 = vst.msk [vmem:[%s368_s24] sm:$0x1] %vm2952_vm5, %v2949_v29 }
 0x606   : > { %3900 = shalt.err (!%p3897_p0)
}
 0x607   : > { %s3901_s22 = scalar_lea.hbm %s4566_s16, 16  ;;  %s3905_s24 = scalar_lea.hbm %s4610_s9, 32 }
 0x608   : > { %p3902_p6 = scmp.ne.s32.totalorder %s4566_s16, %s3901_s22  ;;  %p3906_p1 = scmp.lt.s32.totalorder %s4566_s16, %s4610_s9 }
 0x609   : > { %p3907_p5 = scmp.lt.s32.totalorder %s3905_s24, %s3901_s22 }
 0x60a   : > { %p3903_p9 = pnand %p3902_p6, %p4633_p3 }
 0x60b   : > { %p3908_p10 = por %p3907_p5, %p3906_p1 }
 0x60c   : > { %p3904_p13 = pneg %p3903_p9 }
 0x60e   : > { %p3909_p12 = pnand %p3908_p10, %p3904_p13 }
 0x610   : > { %3912 = shalt.err (!%p3909_p12)
}
 0x611   : > { %3436 = dma.vmem_to_hbm [thread:$0]  (%p4633_p3), %s2968_s26, 16, %s4566_s16, %s2955_s25  }
 0x612 PF: > { %p3458_p2 = scmp.ge.s32.totalorder %s3955_s12, 2  ;;  %s2979_s27 = sand.u32 1, %s3943_s30  }
 0x613   : > { %p4634_p4 = scmp.ne.s32.totalorder %s4614_s20, 0  ;;  %s2980_s13 = scalar_lea.sflag [#allocation8], %s2979_s27 }
 0x615   : > { %p3449_p7 = pnand %p3458_p2, %p4634_p4 }
 0x617   : > { %p3450_p8 = pneg %p3449_p7 }
 0x619   : > { %3938 = dma.done.wait (%p3450_p8), %s2980_s13, 16  }
 0x61a   : > { %3940 = vsyncadd (%p3450_p8), %s2980_s13, 4294967280  ;;  %p21_p11 = scmp.ge.s32.totalorder %s4041_s15, 4   ;;  %s4635_s30 = smov %s3947_s10 }
 0x61b   : > { %s4636_s10 = smov %s3951_s11  ;;  %s4637_s11 = smov %s4052_s18 }
 0x61c   : > { %s4638_s12 = smov %s4041_s15  ;;  %23 = sbr.rel (!%p21_p11) target bundleno = 5 (0x5), region = 112 }
 0x621   :  { %2984 = vsyncpa [#allocation7], 1 }
 0x622   :  { %2986 = vsyncpa [#allocation7 + $0x1], 1 }
 0x623   :  { %2987 = vsyncpa [#allocation10], 1 }
 0x624   :  { %2988 = vsyncpa [#allocation8], 1 }
 0x625   :  { %2990 = vsyncpa [#allocation8 + $0x1], 1 }

</bundles_post_ra>
